<compile_context>
chip_gen: v5e
topology: v5e:2x2
jax: 0.10.0
libtpu: 0.0.40
codegen_flags: <defaults>
</compile_context>

<pallas_src>
import functools

import jax
import jax.numpy as jnp
from jax.experimental import pallas as pl
from jax.experimental.pallas import tpu as pltpu


# -----------------------------------------------------------------------------
# In-kernel helpers
# -----------------------------------------------------------------------------
def _lstm_cell(gates, c, H):
    """gates: (B, 4H) pre-activations in PyTorch order (i, f, g, o)."""
    sig = jax.nn.sigmoid(gates)          # full-width EUP pass
    th = jnp.tanh(gates)                 # full-width EUP pass
    i_g = sig[:, 0:H]
    f_g = sig[:, H:2 * H]
    g_g = th[:, 2 * H:3 * H]
    o_g = sig[:, 3 * H:4 * H]
    c_new = f_g * c + i_g * g_g
    h_new = o_g * jnp.tanh(c_new)
    return h_new, c_new


# -----------------------------------------------------------------------------
# Fully fused Pallas kernel: all LSTM layers + MLP head in one call
# -----------------------------------------------------------------------------
def _stock_predictor_kernel(*refs, T, B, H, n_layers, n_mlp):
    """refs layout:
        [0]                      x_ref        (T*B, Din)  time-major flattened
        per LSTM layer l (4 refs each):
            wih   (Din_l, 8H)   [fwd 4H | bwd 4H] input->gate weights
            whh_f (H, 4H)       forward hidden->gate weights
            whh_b (H, 4H)       backward hidden->gate weights
            b     (1, 8H)       folded biases (b_ih + b_hh), fwd | bwd
        per MLP layer i (2 refs each): w (in, out), b (1, out)
        [-1]                     out_ref      (B, out_features)
    """
    x_ref = refs[0]
    idx = 1
    layer_refs = []
    for _ in range(n_layers):
        layer_refs.append(refs[idx:idx + 4])
        idx += 4
    mlp_refs = refs[idx:idx + 2 * n_mlp]
    out_ref = refs[idx + 2 * n_mlp]

    h_seq = x_ref[...].astype(jnp.float32)                    # (T*B, Din)
    feat = None

    for l in range(n_layers):
        wih_ref, whhf_ref, whhb_ref, b_ref = layer_refs[l]
        last = (l == n_layers - 1)

        # Hoisted input projection: one matmul for all timesteps & directions.
        gx = jnp.dot(h_seq, wih_ref[...],
                     preferred_element_type=jnp.float32) + b_ref[...]  # (T*B, 8H)
        whhf = whhf_ref[...]

        # Forward direction (unrolled; t=0 has h=0 -> skip h@W_hh matmul).
        c = jnp.zeros((B, H), jnp.float32)
        h = None
        outs_f = []
        for t in range(T):
            g = gx[t * B:(t + 1) * B, 0:4 * H]
            if t > 0:
                g = g + jnp.dot(h, whhf, preferred_element_type=jnp.float32)
            h, c = _lstm_cell(g, c, H)
            if not last:
                outs_f.append(h)
        h_f_last = h

        if last:
            # Backward direction: only h_bwd[T-1] is needed, which is the
            # FIRST backward step -> single cell eval with h0 = c0 = 0.
            g_b = gx[(T - 1) * B:T * B, 4 * H:8 * H]
            h_b_last, _ = _lstm_cell(g_b, jnp.zeros((B, H), jnp.float32), H)
            feat = jnp.concatenate([h_f_last, h_b_last], axis=-1)      # (B, 2H)
        else:
            # Full backward recurrence producing the whole sequence.
            whhb = whhb_ref[...]
            c = jnp.zeros((B, H), jnp.float32)
            h = None
            outs_b = [None] * T
            for k, t in enumerate(range(T - 1, -1, -1)):
                g = gx[t * B:(t + 1) * B, 4 * H:8 * H]
                if k > 0:
                    g = g + jnp.dot(h, whhb, preferred_element_type=jnp.float32)
                h, c = _lstm_cell(g, c, H)
                outs_b[t] = h
            h_seq = jnp.concatenate(
                [jnp.concatenate(outs_f, axis=0),
                 jnp.concatenate(outs_b, axis=0)], axis=-1)            # (T*B, 2H)

    # nn.Dropout: identity in inference mode.

    # Fused MLP head.
    for i in range(n_mlp):
        w = mlp_refs[2 * i][...]
        bb = mlp_refs[2 * i + 1][...]
        feat = jnp.dot(feat, w, preferred_element_type=jnp.float32) + bb
        if i < n_mlp - 1:
            feat = jnp.maximum(feat, 0.0)

    out_ref[...] = feat.astype(out_ref.dtype)


# -----------------------------------------------------------------------------
# Wrappers
# -----------------------------------------------------------------------------
def _vmem():
    return pl.BlockSpec(memory_space=pltpu.MemorySpace.VMEM)


def prepare_params(params):
    """One-time parameter prep: transpose, concat directions, fold biases."""
    prep = {"lstm": [], "mlp": []}
    for lp in params["lstm"]:
        H = lp["w_hh_f"].shape[1]
        wih = jnp.concatenate(
            [jnp.transpose(lp["w_ih_f"]), jnp.transpose(lp["w_ih_b"])], axis=1)
        b = jnp.concatenate(
            [lp["b_ih_f"] + lp["b_hh_f"], lp["b_ih_b"] + lp["b_hh_b"]]
        ).reshape(1, 8 * H)
        prep["lstm"].append({
            "wih": wih.astype(jnp.float32),                             # (Din, 8H)
            "whh_f": jnp.transpose(lp["w_hh_f"]).astype(jnp.float32),   # (H, 4H)
            "whh_b": jnp.transpose(lp["w_hh_b"]).astype(jnp.float32),   # (H, 4H)
            "b": b.astype(jnp.float32),                                 # (1, 8H)
        })
    for w, b in params["mlp"]:
        prep["mlp"].append((jnp.transpose(w).astype(jnp.float32),
                            b.reshape(1, -1).astype(jnp.float32)))
    return prep


def stock_predictor_forward(x, prep):
    """x: (B, T, input_size) -> (B, mlp_sizes[-1]). One pallas_call total."""
    B, T, Din = x.shape
    lstm_layers = prep["lstm"]
    mlp_params = prep["mlp"]
    H = lstm_layers[0]["whh_f"].shape[0]
    n_layers = len(lstm_layers)
    n_mlp = len(mlp_params)
    out_f = mlp_params[-1][0].shape[1]

    # Time-major, flattened to (T*B, Din).
    x2d = jnp.transpose(x, (1, 0, 2)).reshape(T * B, Din).astype(jnp.float32)

    flat = [x2d]
    for lp in lstm_layers:
        flat += [lp["wih"], lp["whh_f"], lp["whh_b"], lp["b"]]
    for w, b in mlp_params:
        flat += [w, b]

    kernel = functools.partial(_stock_predictor_kernel, T=T, B=B, H=H,
                               n_layers=n_layers, n_mlp=n_mlp)
    return pl.pallas_call(
        kernel,
        out_shape=jax.ShapeDtypeStruct((B, out_f), jnp.float32),
        in_specs=[_vmem()] * len(flat),
        out_specs=_vmem(),
    )(*flat)


# -----------------------------------------------------------------------------
# Deterministic parameter init (matches nn.LSTM / nn.Linear parameter shapes)
# -----------------------------------------------------------------------------
def init_params(key, input_size, hidden, num_layers, mlp_sizes):
    params = {"lstm": [], "mlp": []}
    k = key
    for l in range(num_layers):
        din = input_size if l == 0 else 2 * hidden
        layer = {}
        for d in ("f", "b"):
            k, k1, k2, k3, k4 = jax.random.split(k, 5)
            layer[f"w_ih_{d}"] = 0.1 * jax.random.normal(k1, (4 * hidden, din), jnp.float32)
            layer[f"w_hh_{d}"] = 0.1 * jax.random.normal(k2, (4 * hidden, hidden), jnp.float32)
            layer[f"b_ih_{d}"] = 0.1 * jax.random.normal(k3, (4 * hidden,), jnp.float32)
            layer[f"b_hh_{d}"] = 0.1 * jax.random.normal(k4, (4 * hidden,), jnp.float32)
        params["lstm"].append(layer)
    cur = mlp_sizes[0]
    for s in mlp_sizes[1:]:
        k, k1, k2 = jax.random.split(k, 3)
        params["mlp"].append((
            0.1 * jax.random.normal(k1, (s, cur), jnp.float32),
            0.1 * jax.random.normal(k2, (s,), jnp.float32),
        ))
        cur = s
    return params


# -----------------------------------------------------------------------------
# Pure-JAX reference (for correctness check)
# -----------------------------------------------------------------------------
def _lstm_cell_ref(x_t, h, c, w_ih, w_hh, b_ih, b_hh):
    gates = x_t @ w_ih.T + h @ w_hh.T + b_ih + b_hh
    H = h.shape[-1]
    i = jax.nn.sigmoid(gates[:, :H])
    f = jax.nn.sigmoid(gates[:, H:2 * H])
    g = jnp.tanh(gates[:, 2 * H:3 * H])
    o = jax.nn.sigmoid(gates[:, 3 * H:])
    c = f * c + i * g
    h = o * jnp.tanh(c)
    return h, c


def reference_forward(x, params):
    B, T, _ = x.shape
    layer_in = x
    for lp in params["lstm"]:
        H = lp["w_hh_f"].shape[1]
        h = jnp.zeros((B, H), jnp.float32)
        c = jnp.zeros((B, H), jnp.float32)
        outs_f = []
        for t in range(T):
            h, c = _lstm_cell_ref(layer_in[:, t, :], h, c,
                                  lp["w_ih_f"], lp["w_hh_f"], lp["b_ih_f"], lp["b_hh_f"])
            outs_f.append(h)
        h = jnp.zeros((B, H), jnp.float32)
        c = jnp.zeros((B, H), jnp.float32)
        outs_b = [None] * T
        for t in range(T - 1, -1, -1):
            h, c = _lstm_cell_ref(layer_in[:, t, :], h, c,
                                  lp["w_ih_b"], lp["w_hh_b"], lp["b_ih_b"], lp["b_hh_b"])
            outs_b[t] = h
        layer_in = jnp.concatenate(
            [jnp.stack(outs_f, axis=1), jnp.stack(outs_b, axis=1)], axis=-1)
    h = layer_in[:, -1, :]
    n = len(params["mlp"])
    for idx, (w, b) in enumerate(params["mlp"]):
        h = h @ w.T + b
        if idx < n - 1:
            h = jnp.maximum(h, 0.0)
    return h


# -----------------------------------------------------------------------------
if __name__ == "__main__":
    # Small config: input_size=4, lstm_hidden_size=32, num_lstm_layers=2,
    # mlp_sizes=[64, 32, 1] (64 == 2 * hidden), dropout_rate ignored at inference.
    INPUT_SIZE = 4
    HIDDEN = 32
    NUM_LAYERS = 2
    MLP_SIZES = [2 * HIDDEN, 32, 1]
    B, T = 2, 8

    key = jax.random.PRNGKey(0)
    k_x, k_p = jax.random.split(key)
    x = jax.random.normal(k_x, (B, T, INPUT_SIZE), jnp.float32)
    params = init_params(k_p, INPUT_SIZE, HIDDEN, NUM_LAYERS, MLP_SIZES)

    # One-time weight prep (transpose / concat / bias-fold), then forward.
    prep = prepare_params(params)
    out = jax.block_until_ready(stock_predictor_forward(x, prep))

    ref = jax.block_until_ready(reference_forward(x, params))
    assert out.shape == (B, MLP_SIZES[-1])
    assert jnp.allclose(out, ref, atol=1e-4, rtol=1e-4), (out, ref)

    print("KERNEL_OK")
</pallas_src>

<mosaic_0001>
module attributes {stable_mosaic.version = 11 : i64} {
  func.func @_stock_predictor_kernel(%arg0: memref<16x4xf32, #tpu.memory_space<vmem>>, %arg1: memref<4x256xf32, #tpu.memory_space<vmem>>, %arg2: memref<32x128xf32, #tpu.memory_space<vmem>>, %arg3: memref<32x128xf32, #tpu.memory_space<vmem>>, %arg4: memref<1x256xf32, #tpu.memory_space<vmem>>, %arg5: memref<64x256xf32, #tpu.memory_space<vmem>>, %arg6: memref<32x128xf32, #tpu.memory_space<vmem>>, %arg7: memref<32x128xf32, #tpu.memory_space<vmem>>, %arg8: memref<1x256xf32, #tpu.memory_space<vmem>>, %arg9: memref<64x32xf32, #tpu.memory_space<vmem>>, %arg10: memref<1x32xf32, #tpu.memory_space<vmem>>, %arg11: memref<32x1xf32, #tpu.memory_space<vmem>>, %arg12: memref<1x1xf32, #tpu.memory_space<vmem>>, %arg13: memref<2x1xf32, #tpu.memory_space<vmem>>) attributes {dimension_semantics = [], scalar_prefetch = 0 : i64, scratch_operands = 0 : i64, tpu.core_type = #tpu.core_type<tc>} {
    %c0 = arith.constant 0 : index
    %c0_0 = arith.constant 0 : index
    %0 = vector.load %arg0[%c0, %c0_0] : memref<16x4xf32, #tpu.memory_space<vmem>>, vector<16x4xf32>
    %c0_1 = arith.constant 0 : index
    %c0_2 = arith.constant 0 : index
    %1 = vector.load %arg1[%c0_1, %c0_2] : memref<4x256xf32, #tpu.memory_space<vmem>>, vector<4x256xf32>
    %cst = arith.constant dense<0.000000e+00> : vector<16x256xf32>
    %2 = tpu.matmul %0, %1, %cst {dimension_numbers = #tpu.dot_dimension_numbers<[1], [0], [0], [1], [0, 0, 1, 1], [], []>} : vector<16x4xf32>, vector<4x256xf32>, vector<16x256xf32> -> vector<16x256xf32>
    %c0_3 = arith.constant 0 : index
    %c0_4 = arith.constant 0 : index
    %3 = vector.load %arg4[%c0_3, %c0_4] : memref<1x256xf32, #tpu.memory_space<vmem>>, vector<1x256xf32>
    %4 = vector.broadcast %3 : vector<1x256xf32> to vector<16x256xf32>
    %5 = arith.addf %2, %4 : vector<16x256xf32>
    %c0_5 = arith.constant 0 : index
    %c0_6 = arith.constant 0 : index
    %6 = vector.load %arg2[%c0_5, %c0_6] : memref<32x128xf32, #tpu.memory_space<vmem>>, vector<32x128xf32>
    %cst_7 = arith.constant 0.000000e+00 : f32
    %7 = vector.broadcast %cst_7 : f32 to vector<2x32xf32>
    %8 = vector.extract_strided_slice %5 {offsets = [0, 0], sizes = [2, 128], strides = [1, 1]} : vector<16x256xf32> to vector<2x128xf32>
    %9 = arith.negf %8 : vector<2x128xf32>
    %10 = math.exp %9 : vector<2x128xf32>
    %cst_8 = arith.constant 1.000000e+00 : f32
    %11 = vector.broadcast %cst_8 : f32 to vector<2x128xf32>
    %12 = arith.addf %11, %10 : vector<2x128xf32>
    %13 = arith.divf %11, %12 : vector<2x128xf32>
    %14 = math.tanh %8 : vector<2x128xf32>
    %15 = vector.extract_strided_slice %13 {offsets = [0, 0], sizes = [2, 32], strides = [1, 1]} : vector<2x128xf32> to vector<2x32xf32>
    %16 = vector.extract_strided_slice %13 {offsets = [0, 32], sizes = [2, 32], strides = [1, 1]} : vector<2x128xf32> to vector<2x32xf32>
    %17 = vector.extract_strided_slice %14 {offsets = [0, 64], sizes = [2, 32], strides = [1, 1]} : vector<2x128xf32> to vector<2x32xf32>
    %18 = vector.extract_strided_slice %13 {offsets = [0, 96], sizes = [2, 32], strides = [1, 1]} : vector<2x128xf32> to vector<2x32xf32>
    %19 = arith.mulf %16, %7 : vector<2x32xf32>
    %20 = arith.mulf %15, %17 : vector<2x32xf32>
    %21 = arith.addf %19, %20 : vector<2x32xf32>
    %22 = math.tanh %21 : vector<2x32xf32>
    %23 = arith.mulf %18, %22 : vector<2x32xf32>
    %24 = vector.extract_strided_slice %5 {offsets = [2, 0], sizes = [2, 128], strides = [1, 1]} : vector<16x256xf32> to vector<2x128xf32>
    %cst_9 = arith.constant dense<0.000000e+00> : vector<2x128xf32>
    %25 = tpu.matmul %23, %6, %cst_9 {dimension_numbers = #tpu.dot_dimension_numbers<[1], [0], [0], [1], [0, 0, 1, 1], [], []>} : vector<2x32xf32>, vector<32x128xf32>, vector<2x128xf32> -> vector<2x128xf32>
    %26 = arith.addf %24, %25 : vector<2x128xf32>
    %27 = arith.negf %26 : vector<2x128xf32>
    %28 = math.exp %27 : vector<2x128xf32>
    %cst_10 = arith.constant 1.000000e+00 : f32
    %29 = vector.broadcast %cst_10 : f32 to vector<2x128xf32>
    %30 = arith.addf %29, %28 : vector<2x128xf32>
    %31 = arith.divf %29, %30 : vector<2x128xf32>
    %32 = math.tanh %26 : vector<2x128xf32>
    %33 = vector.extract_strided_slice %31 {offsets = [0, 0], sizes = [2, 32], strides = [1, 1]} : vector<2x128xf32> to vector<2x32xf32>
    %34 = vector.extract_strided_slice %31 {offsets = [0, 32], sizes = [2, 32], strides = [1, 1]} : vector<2x128xf32> to vector<2x32xf32>
    %35 = vector.extract_strided_slice %32 {offsets = [0, 64], sizes = [2, 32], strides = [1, 1]} : vector<2x128xf32> to vector<2x32xf32>
    %36 = vector.extract_strided_slice %31 {offsets = [0, 96], sizes = [2, 32], strides = [1, 1]} : vector<2x128xf32> to vector<2x32xf32>
    %37 = arith.mulf %34, %21 : vector<2x32xf32>
    %38 = arith.mulf %33, %35 : vector<2x32xf32>
    %39 = arith.addf %37, %38 : vector<2x32xf32>
    %40 = math.tanh %39 : vector<2x32xf32>
    %41 = arith.mulf %36, %40 : vector<2x32xf32>
    %42 = vector.extract_strided_slice %5 {offsets = [4, 0], sizes = [2, 128], strides = [1, 1]} : vector<16x256xf32> to vector<2x128xf32>
    %cst_11 = arith.constant dense<0.000000e+00> : vector<2x128xf32>
    %43 = tpu.matmul %41, %6, %cst_11 {dimension_numbers = #tpu.dot_dimension_numbers<[1], [0], [0], [1], [0, 0, 1, 1], [], []>} : vector<2x32xf32>, vector<32x128xf32>, vector<2x128xf32> -> vector<2x128xf32>
    %44 = arith.addf %42, %43 : vector<2x128xf32>
    %45 = arith.negf %44 : vector<2x128xf32>
    %46 = math.exp %45 : vector<2x128xf32>
    %cst_12 = arith.constant 1.000000e+00 : f32
    %47 = vector.broadcast %cst_12 : f32 to vector<2x128xf32>
    %48 = arith.addf %47, %46 : vector<2x128xf32>
    %49 = arith.divf %47, %48 : vector<2x128xf32>
    %50 = math.tanh %44 : vector<2x128xf32>
    %51 = vector.extract_strided_slice %49 {offsets = [0, 0], sizes = [2, 32], strides = [1, 1]} : vector<2x128xf32> to vector<2x32xf32>
    %52 = vector.extract_strided_slice %49 {offsets = [0, 32], sizes = [2, 32], strides = [1, 1]} : vector<2x128xf32> to vector<2x32xf32>
    %53 = vector.extract_strided_slice %50 {offsets = [0, 64], sizes = [2, 32], strides = [1, 1]} : vector<2x128xf32> to vector<2x32xf32>
    %54 = vector.extract_strided_slice %49 {offsets = [0, 96], sizes = [2, 32], strides = [1, 1]} : vector<2x128xf32> to vector<2x32xf32>
    %55 = arith.mulf %52, %39 : vector<2x32xf32>
    %56 = arith.mulf %51, %53 : vector<2x32xf32>
    %57 = arith.addf %55, %56 : vector<2x32xf32>
    %58 = math.tanh %57 : vector<2x32xf32>
    %59 = arith.mulf %54, %58 : vector<2x32xf32>
    %60 = vector.extract_strided_slice %5 {offsets = [6, 0], sizes = [2, 128], strides = [1, 1]} : vector<16x256xf32> to vector<2x128xf32>
    %cst_13 = arith.constant dense<0.000000e+00> : vector<2x128xf32>
    %61 = tpu.matmul %59, %6, %cst_13 {dimension_numbers = #tpu.dot_dimension_numbers<[1], [0], [0], [1], [0, 0, 1, 1], [], []>} : vector<2x32xf32>, vector<32x128xf32>, vector<2x128xf32> -> vector<2x128xf32>
    %62 = arith.addf %60, %61 : vector<2x128xf32>
    %63 = arith.negf %62 : vector<2x128xf32>
    %64 = math.exp %63 : vector<2x128xf32>
    %cst_14 = arith.constant 1.000000e+00 : f32
    %65 = vector.broadcast %cst_14 : f32 to vector<2x128xf32>
    %66 = arith.addf %65, %64 : vector<2x128xf32>
    %67 = arith.divf %65, %66 : vector<2x128xf32>
    %68 = math.tanh %62 : vector<2x128xf32>
    %69 = vector.extract_strided_slice %67 {offsets = [0, 0], sizes = [2, 32], strides = [1, 1]} : vector<2x128xf32> to vector<2x32xf32>
    %70 = vector.extract_strided_slice %67 {offsets = [0, 32], sizes = [2, 32], strides = [1, 1]} : vector<2x128xf32> to vector<2x32xf32>
    %71 = vector.extract_strided_slice %68 {offsets = [0, 64], sizes = [2, 32], strides = [1, 1]} : vector<2x128xf32> to vector<2x32xf32>
    %72 = vector.extract_strided_slice %67 {offsets = [0, 96], sizes = [2, 32], strides = [1, 1]} : vector<2x128xf32> to vector<2x32xf32>
    %73 = arith.mulf %70, %57 : vector<2x32xf32>
    %74 = arith.mulf %69, %71 : vector<2x32xf32>
    %75 = arith.addf %73, %74 : vector<2x32xf32>
    %76 = math.tanh %75 : vector<2x32xf32>
    %77 = arith.mulf %72, %76 : vector<2x32xf32>
    %78 = vector.extract_strided_slice %5 {offsets = [8, 0], sizes = [2, 128], strides = [1, 1]} : vector<16x256xf32> to vector<2x128xf32>
    %cst_15 = arith.constant dense<0.000000e+00> : vector<2x128xf32>
    %79 = tpu.matmul %77, %6, %cst_15 {dimension_numbers = #tpu.dot_dimension_numbers<[1], [0], [0], [1], [0, 0, 1, 1], [], []>} : vector<2x32xf32>, vector<32x128xf32>, vector<2x128xf32> -> vector<2x128xf32>
    %80 = arith.addf %78, %79 : vector<2x128xf32>
    %81 = arith.negf %80 : vector<2x128xf32>
    %82 = math.exp %81 : vector<2x128xf32>
    %cst_16 = arith.constant 1.000000e+00 : f32
    %83 = vector.broadcast %cst_16 : f32 to vector<2x128xf32>
    %84 = arith.addf %83, %82 : vector<2x128xf32>
    %85 = arith.divf %83, %84 : vector<2x128xf32>
    %86 = math.tanh %80 : vector<2x128xf32>
    %87 = vector.extract_strided_slice %85 {offsets = [0, 0], sizes = [2, 32], strides = [1, 1]} : vector<2x128xf32> to vector<2x32xf32>
    %88 = vector.extract_strided_slice %85 {offsets = [0, 32], sizes = [2, 32], strides = [1, 1]} : vector<2x128xf32> to vector<2x32xf32>
    %89 = vector.extract_strided_slice %86 {offsets = [0, 64], sizes = [2, 32], strides = [1, 1]} : vector<2x128xf32> to vector<2x32xf32>
    %90 = vector.extract_strided_slice %85 {offsets = [0, 96], sizes = [2, 32], strides = [1, 1]} : vector<2x128xf32> to vector<2x32xf32>
    %91 = arith.mulf %88, %75 : vector<2x32xf32>
    %92 = arith.mulf %87, %89 : vector<2x32xf32>
    %93 = arith.addf %91, %92 : vector<2x32xf32>
    %94 = math.tanh %93 : vector<2x32xf32>
    %95 = arith.mulf %90, %94 : vector<2x32xf32>
    %96 = vector.extract_strided_slice %5 {offsets = [10, 0], sizes = [2, 128], strides = [1, 1]} : vector<16x256xf32> to vector<2x128xf32>
    %cst_17 = arith.constant dense<0.000000e+00> : vector<2x128xf32>
    %97 = tpu.matmul %95, %6, %cst_17 {dimension_numbers = #tpu.dot_dimension_numbers<[1], [0], [0], [1], [0, 0, 1, 1], [], []>} : vector<2x32xf32>, vector<32x128xf32>, vector<2x128xf32> -> vector<2x128xf32>
    %98 = arith.addf %96, %97 : vector<2x128xf32>
    %99 = arith.negf %98 : vector<2x128xf32>
    %100 = math.exp %99 : vector<2x128xf32>
    %cst_18 = arith.constant 1.000000e+00 : f32
    %101 = vector.broadcast %cst_18 : f32 to vector<2x128xf32>
    %102 = arith.addf %101, %100 : vector<2x128xf32>
    %103 = arith.divf %101, %102 : vector<2x128xf32>
    %104 = math.tanh %98 : vector<2x128xf32>
    %105 = vector.extract_strided_slice %103 {offsets = [0, 0], sizes = [2, 32], strides = [1, 1]} : vector<2x128xf32> to vector<2x32xf32>
    %106 = vector.extract_strided_slice %103 {offsets = [0, 32], sizes = [2, 32], strides = [1, 1]} : vector<2x128xf32> to vector<2x32xf32>
    %107 = vector.extract_strided_slice %104 {offsets = [0, 64], sizes = [2, 32], strides = [1, 1]} : vector<2x128xf32> to vector<2x32xf32>
    %108 = vector.extract_strided_slice %103 {offsets = [0, 96], sizes = [2, 32], strides = [1, 1]} : vector<2x128xf32> to vector<2x32xf32>
    %109 = arith.mulf %106, %93 : vector<2x32xf32>
    %110 = arith.mulf %105, %107 : vector<2x32xf32>
    %111 = arith.addf %109, %110 : vector<2x32xf32>
    %112 = math.tanh %111 : vector<2x32xf32>
    %113 = arith.mulf %108, %112 : vector<2x32xf32>
    %114 = vector.extract_strided_slice %5 {offsets = [12, 0], sizes = [2, 128], strides = [1, 1]} : vector<16x256xf32> to vector<2x128xf32>
    %cst_19 = arith.constant dense<0.000000e+00> : vector<2x128xf32>
    %115 = tpu.matmul %113, %6, %cst_19 {dimension_numbers = #tpu.dot_dimension_numbers<[1], [0], [0], [1], [0, 0, 1, 1], [], []>} : vector<2x32xf32>, vector<32x128xf32>, vector<2x128xf32> -> vector<2x128xf32>
    %116 = arith.addf %114, %115 : vector<2x128xf32>
    %117 = arith.negf %116 : vector<2x128xf32>
    %118 = math.exp %117 : vector<2x128xf32>
    %cst_20 = arith.constant 1.000000e+00 : f32
    %119 = vector.broadcast %cst_20 : f32 to vector<2x128xf32>
    %120 = arith.addf %119, %118 : vector<2x128xf32>
    %121 = arith.divf %119, %120 : vector<2x128xf32>
    %122 = math.tanh %116 : vector<2x128xf32>
    %123 = vector.extract_strided_slice %121 {offsets = [0, 0], sizes = [2, 32], strides = [1, 1]} : vector<2x128xf32> to vector<2x32xf32>
    %124 = vector.extract_strided_slice %121 {offsets = [0, 32], sizes = [2, 32], strides = [1, 1]} : vector<2x128xf32> to vector<2x32xf32>
    %125 = vector.extract_strided_slice %122 {offsets = [0, 64], sizes = [2, 32], strides = [1, 1]} : vector<2x128xf32> to vector<2x32xf32>
    %126 = vector.extract_strided_slice %121 {offsets = [0, 96], sizes = [2, 32], strides = [1, 1]} : vector<2x128xf32> to vector<2x32xf32>
    %127 = arith.mulf %124, %111 : vector<2x32xf32>
    %128 = arith.mulf %123, %125 : vector<2x32xf32>
    %129 = arith.addf %127, %128 : vector<2x32xf32>
    %130 = math.tanh %129 : vector<2x32xf32>
    %131 = arith.mulf %126, %130 : vector<2x32xf32>
    %132 = vector.extract_strided_slice %5 {offsets = [14, 0], sizes = [2, 128], strides = [1, 1]} : vector<16x256xf32> to vector<2x128xf32>
    %cst_21 = arith.constant dense<0.000000e+00> : vector<2x128xf32>
    %133 = tpu.matmul %131, %6, %cst_21 {dimension_numbers = #tpu.dot_dimension_numbers<[1], [0], [0], [1], [0, 0, 1, 1], [], []>} : vector<2x32xf32>, vector<32x128xf32>, vector<2x128xf32> -> vector<2x128xf32>
    %134 = arith.addf %132, %133 : vector<2x128xf32>
    %135 = arith.negf %134 : vector<2x128xf32>
    %136 = math.exp %135 : vector<2x128xf32>
    %cst_22 = arith.constant 1.000000e+00 : f32
    %137 = vector.broadcast %cst_22 : f32 to vector<2x128xf32>
    %138 = arith.addf %137, %136 : vector<2x128xf32>
    %139 = arith.divf %137, %138 : vector<2x128xf32>
    %140 = math.tanh %134 : vector<2x128xf32>
    %141 = vector.extract_strided_slice %139 {offsets = [0, 0], sizes = [2, 32], strides = [1, 1]} : vector<2x128xf32> to vector<2x32xf32>
    %142 = vector.extract_strided_slice %139 {offsets = [0, 32], sizes = [2, 32], strides = [1, 1]} : vector<2x128xf32> to vector<2x32xf32>
    %143 = vector.extract_strided_slice %140 {offsets = [0, 64], sizes = [2, 32], strides = [1, 1]} : vector<2x128xf32> to vector<2x32xf32>
    %144 = vector.extract_strided_slice %139 {offsets = [0, 96], sizes = [2, 32], strides = [1, 1]} : vector<2x128xf32> to vector<2x32xf32>
    %145 = arith.mulf %142, %129 : vector<2x32xf32>
    %146 = arith.mulf %141, %143 : vector<2x32xf32>
    %147 = arith.addf %145, %146 : vector<2x32xf32>
    %148 = math.tanh %147 : vector<2x32xf32>
    %149 = arith.mulf %144, %148 : vector<2x32xf32>
    %c0_23 = arith.constant 0 : index
    %c0_24 = arith.constant 0 : index
    %150 = vector.load %arg3[%c0_23, %c0_24] : memref<32x128xf32, #tpu.memory_space<vmem>>, vector<32x128xf32>
    %cst_25 = arith.constant 0.000000e+00 : f32
    %151 = vector.broadcast %cst_25 : f32 to vector<2x32xf32>
    %152 = vector.extract_strided_slice %5 {offsets = [14, 128], sizes = [2, 128], strides = [1, 1]} : vector<16x256xf32> to vector<2x128xf32>
    %153 = arith.negf %152 : vector<2x128xf32>
    %154 = math.exp %153 : vector<2x128xf32>
    %cst_26 = arith.constant 1.000000e+00 : f32
    %155 = vector.broadcast %cst_26 : f32 to vector<2x128xf32>
    %156 = arith.addf %155, %154 : vector<2x128xf32>
    %157 = arith.divf %155, %156 : vector<2x128xf32>
    %158 = math.tanh %152 : vector<2x128xf32>
    %159 = vector.extract_strided_slice %157 {offsets = [0, 0], sizes = [2, 32], strides = [1, 1]} : vector<2x128xf32> to vector<2x32xf32>
    %160 = vector.extract_strided_slice %157 {offsets = [0, 32], sizes = [2, 32], strides = [1, 1]} : vector<2x128xf32> to vector<2x32xf32>
    %161 = vector.extract_strided_slice %158 {offsets = [0, 64], sizes = [2, 32], strides = [1, 1]} : vector<2x128xf32> to vector<2x32xf32>
    %162 = vector.extract_strided_slice %157 {offsets = [0, 96], sizes = [2, 32], strides = [1, 1]} : vector<2x128xf32> to vector<2x32xf32>
    %163 = arith.mulf %160, %151 : vector<2x32xf32>
    %164 = arith.mulf %159, %161 : vector<2x32xf32>
    %165 = arith.addf %163, %164 : vector<2x32xf32>
    %166 = math.tanh %165 : vector<2x32xf32>
    %167 = arith.mulf %162, %166 : vector<2x32xf32>
    %168 = vector.extract_strided_slice %5 {offsets = [12, 128], sizes = [2, 128], strides = [1, 1]} : vector<16x256xf32> to vector<2x128xf32>
    %cst_27 = arith.constant dense<0.000000e+00> : vector<2x128xf32>
    %169 = tpu.matmul %167, %150, %cst_27 {dimension_numbers = #tpu.dot_dimension_numbers<[1], [0], [0], [1], [0, 0, 1, 1], [], []>} : vector<2x32xf32>, vector<32x128xf32>, vector<2x128xf32> -> vector<2x128xf32>
    %170 = arith.addf %168, %169 : vector<2x128xf32>
    %171 = arith.negf %170 : vector<2x128xf32>
    %172 = math.exp %171 : vector<2x128xf32>
    %cst_28 = arith.constant 1.000000e+00 : f32
    %173 = vector.broadcast %cst_28 : f32 to vector<2x128xf32>
    %174 = arith.addf %173, %172 : vector<2x128xf32>
    %175 = arith.divf %173, %174 : vector<2x128xf32>
    %176 = math.tanh %170 : vector<2x128xf32>
    %177 = vector.extract_strided_slice %175 {offsets = [0, 0], sizes = [2, 32], strides = [1, 1]} : vector<2x128xf32> to vector<2x32xf32>
    %178 = vector.extract_strided_slice %175 {offsets = [0, 32], sizes = [2, 32], strides = [1, 1]} : vector<2x128xf32> to vector<2x32xf32>
    %179 = vector.extract_strided_slice %176 {offsets = [0, 64], sizes = [2, 32], strides = [1, 1]} : vector<2x128xf32> to vector<2x32xf32>
    %180 = vector.extract_strided_slice %175 {offsets = [0, 96], sizes = [2, 32], strides = [1, 1]} : vector<2x128xf32> to vector<2x32xf32>
    %181 = arith.mulf %178, %165 : vector<2x32xf32>
    %182 = arith.mulf %177, %179 : vector<2x32xf32>
    %183 = arith.addf %181, %182 : vector<2x32xf32>
    %184 = math.tanh %183 : vector<2x32xf32>
    %185 = arith.mulf %180, %184 : vector<2x32xf32>
    %186 = vector.extract_strided_slice %5 {offsets = [10, 128], sizes = [2, 128], strides = [1, 1]} : vector<16x256xf32> to vector<2x128xf32>
    %cst_29 = arith.constant dense<0.000000e+00> : vector<2x128xf32>
    %187 = tpu.matmul %185, %150, %cst_29 {dimension_numbers = #tpu.dot_dimension_numbers<[1], [0], [0], [1], [0, 0, 1, 1], [], []>} : vector<2x32xf32>, vector<32x128xf32>, vector<2x128xf32> -> vector<2x128xf32>
    %188 = arith.addf %186, %187 : vector<2x128xf32>
    %189 = arith.negf %188 : vector<2x128xf32>
    %190 = math.exp %189 : vector<2x128xf32>
    %cst_30 = arith.constant 1.000000e+00 : f32
    %191 = vector.broadcast %cst_30 : f32 to vector<2x128xf32>
    %192 = arith.addf %191, %190 : vector<2x128xf32>
    %193 = arith.divf %191, %192 : vector<2x128xf32>
    %194 = math.tanh %188 : vector<2x128xf32>
    %195 = vector.extract_strided_slice %193 {offsets = [0, 0], sizes = [2, 32], strides = [1, 1]} : vector<2x128xf32> to vector<2x32xf32>
    %196 = vector.extract_strided_slice %193 {offsets = [0, 32], sizes = [2, 32], strides = [1, 1]} : vector<2x128xf32> to vector<2x32xf32>
    %197 = vector.extract_strided_slice %194 {offsets = [0, 64], sizes = [2, 32], strides = [1, 1]} : vector<2x128xf32> to vector<2x32xf32>
    %198 = vector.extract_strided_slice %193 {offsets = [0, 96], sizes = [2, 32], strides = [1, 1]} : vector<2x128xf32> to vector<2x32xf32>
    %199 = arith.mulf %196, %183 : vector<2x32xf32>
    %200 = arith.mulf %195, %197 : vector<2x32xf32>
    %201 = arith.addf %199, %200 : vector<2x32xf32>
    %202 = math.tanh %201 : vector<2x32xf32>
    %203 = arith.mulf %198, %202 : vector<2x32xf32>
    %204 = vector.extract_strided_slice %5 {offsets = [8, 128], sizes = [2, 128], strides = [1, 1]} : vector<16x256xf32> to vector<2x128xf32>
    %cst_31 = arith.constant dense<0.000000e+00> : vector<2x128xf32>
    %205 = tpu.matmul %203, %150, %cst_31 {dimension_numbers = #tpu.dot_dimension_numbers<[1], [0], [0], [1], [0, 0, 1, 1], [], []>} : vector<2x32xf32>, vector<32x128xf32>, vector<2x128xf32> -> vector<2x128xf32>
    %206 = arith.addf %204, %205 : vector<2x128xf32>
    %207 = arith.negf %206 : vector<2x128xf32>
    %208 = math.exp %207 : vector<2x128xf32>
    %cst_32 = arith.constant 1.000000e+00 : f32
    %209 = vector.broadcast %cst_32 : f32 to vector<2x128xf32>
    %210 = arith.addf %209, %208 : vector<2x128xf32>
    %211 = arith.divf %209, %210 : vector<2x128xf32>
    %212 = math.tanh %206 : vector<2x128xf32>
    %213 = vector.extract_strided_slice %211 {offsets = [0, 0], sizes = [2, 32], strides = [1, 1]} : vector<2x128xf32> to vector<2x32xf32>
    %214 = vector.extract_strided_slice %211 {offsets = [0, 32], sizes = [2, 32], strides = [1, 1]} : vector<2x128xf32> to vector<2x32xf32>
    %215 = vector.extract_strided_slice %212 {offsets = [0, 64], sizes = [2, 32], strides = [1, 1]} : vector<2x128xf32> to vector<2x32xf32>
    %216 = vector.extract_strided_slice %211 {offsets = [0, 96], sizes = [2, 32], strides = [1, 1]} : vector<2x128xf32> to vector<2x32xf32>
    %217 = arith.mulf %214, %201 : vector<2x32xf32>
    %218 = arith.mulf %213, %215 : vector<2x32xf32>
    %219 = arith.addf %217, %218 : vector<2x32xf32>
    %220 = math.tanh %219 : vector<2x32xf32>
    %221 = arith.mulf %216, %220 : vector<2x32xf32>
    %222 = vector.extract_strided_slice %5 {offsets = [6, 128], sizes = [2, 128], strides = [1, 1]} : vector<16x256xf32> to vector<2x128xf32>
    %cst_33 = arith.constant dense<0.000000e+00> : vector<2x128xf32>
    %223 = tpu.matmul %221, %150, %cst_33 {dimension_numbers = #tpu.dot_dimension_numbers<[1], [0], [0], [1], [0, 0, 1, 1], [], []>} : vector<2x32xf32>, vector<32x128xf32>, vector<2x128xf32> -> vector<2x128xf32>
    %224 = arith.addf %222, %223 : vector<2x128xf32>
    %225 = arith.negf %224 : vector<2x128xf32>
    %226 = math.exp %225 : vector<2x128xf32>
    %cst_34 = arith.constant 1.000000e+00 : f32
    %227 = vector.broadcast %cst_34 : f32 to vector<2x128xf32>
    %228 = arith.addf %227, %226 : vector<2x128xf32>
    %229 = arith.divf %227, %228 : vector<2x128xf32>
    %230 = math.tanh %224 : vector<2x128xf32>
    %231 = vector.extract_strided_slice %229 {offsets = [0, 0], sizes = [2, 32], strides = [1, 1]} : vector<2x128xf32> to vector<2x32xf32>
    %232 = vector.extract_strided_slice %229 {offsets = [0, 32], sizes = [2, 32], strides = [1, 1]} : vector<2x128xf32> to vector<2x32xf32>
    %233 = vector.extract_strided_slice %230 {offsets = [0, 64], sizes = [2, 32], strides = [1, 1]} : vector<2x128xf32> to vector<2x32xf32>
    %234 = vector.extract_strided_slice %229 {offsets = [0, 96], sizes = [2, 32], strides = [1, 1]} : vector<2x128xf32> to vector<2x32xf32>
    %235 = arith.mulf %232, %219 : vector<2x32xf32>
    %236 = arith.mulf %231, %233 : vector<2x32xf32>
    %237 = arith.addf %235, %236 : vector<2x32xf32>
    %238 = math.tanh %237 : vector<2x32xf32>
    %239 = arith.mulf %234, %238 : vector<2x32xf32>
    %240 = vector.extract_strided_slice %5 {offsets = [4, 128], sizes = [2, 128], strides = [1, 1]} : vector<16x256xf32> to vector<2x128xf32>
    %cst_35 = arith.constant dense<0.000000e+00> : vector<2x128xf32>
    %241 = tpu.matmul %239, %150, %cst_35 {dimension_numbers = #tpu.dot_dimension_numbers<[1], [0], [0], [1], [0, 0, 1, 1], [], []>} : vector<2x32xf32>, vector<32x128xf32>, vector<2x128xf32> -> vector<2x128xf32>
    %242 = arith.addf %240, %241 : vector<2x128xf32>
    %243 = arith.negf %242 : vector<2x128xf32>
    %244 = math.exp %243 : vector<2x128xf32>
    %cst_36 = arith.constant 1.000000e+00 : f32
    %245 = vector.broadcast %cst_36 : f32 to vector<2x128xf32>
    %246 = arith.addf %245, %244 : vector<2x128xf32>
    %247 = arith.divf %245, %246 : vector<2x128xf32>
    %248 = math.tanh %242 : vector<2x128xf32>
    %249 = vector.extract_strided_slice %247 {offsets = [0, 0], sizes = [2, 32], strides = [1, 1]} : vector<2x128xf32> to vector<2x32xf32>
    %250 = vector.extract_strided_slice %247 {offsets = [0, 32], sizes = [2, 32], strides = [1, 1]} : vector<2x128xf32> to vector<2x32xf32>
    %251 = vector.extract_strided_slice %248 {offsets = [0, 64], sizes = [2, 32], strides = [1, 1]} : vector<2x128xf32> to vector<2x32xf32>
    %252 = vector.extract_strided_slice %247 {offsets = [0, 96], sizes = [2, 32], strides = [1, 1]} : vector<2x128xf32> to vector<2x32xf32>
    %253 = arith.mulf %250, %237 : vector<2x32xf32>
    %254 = arith.mulf %249, %251 : vector<2x32xf32>
    %255 = arith.addf %253, %254 : vector<2x32xf32>
    %256 = math.tanh %255 : vector<2x32xf32>
    %257 = arith.mulf %252, %256 : vector<2x32xf32>
    %258 = vector.extract_strided_slice %5 {offsets = [2, 128], sizes = [2, 128], strides = [1, 1]} : vector<16x256xf32> to vector<2x128xf32>
    %cst_37 = arith.constant dense<0.000000e+00> : vector<2x128xf32>
    %259 = tpu.matmul %257, %150, %cst_37 {dimension_numbers = #tpu.dot_dimension_numbers<[1], [0], [0], [1], [0, 0, 1, 1], [], []>} : vector<2x32xf32>, vector<32x128xf32>, vector<2x128xf32> -> vector<2x128xf32>
    %260 = arith.addf %258, %259 : vector<2x128xf32>
    %261 = arith.negf %260 : vector<2x128xf32>
    %262 = math.exp %261 : vector<2x128xf32>
    %cst_38 = arith.constant 1.000000e+00 : f32
    %263 = vector.broadcast %cst_38 : f32 to vector<2x128xf32>
    %264 = arith.addf %263, %262 : vector<2x128xf32>
    %265 = arith.divf %263, %264 : vector<2x128xf32>
    %266 = math.tanh %260 : vector<2x128xf32>
    %267 = vector.extract_strided_slice %265 {offsets = [0, 0], sizes = [2, 32], strides = [1, 1]} : vector<2x128xf32> to vector<2x32xf32>
    %268 = vector.extract_strided_slice %265 {offsets = [0, 32], sizes = [2, 32], strides = [1, 1]} : vector<2x128xf32> to vector<2x32xf32>
    %269 = vector.extract_strided_slice %266 {offsets = [0, 64], sizes = [2, 32], strides = [1, 1]} : vector<2x128xf32> to vector<2x32xf32>
    %270 = vector.extract_strided_slice %265 {offsets = [0, 96], sizes = [2, 32], strides = [1, 1]} : vector<2x128xf32> to vector<2x32xf32>
    %271 = arith.mulf %268, %255 : vector<2x32xf32>
    %272 = arith.mulf %267, %269 : vector<2x32xf32>
    %273 = arith.addf %271, %272 : vector<2x32xf32>
    %274 = math.tanh %273 : vector<2x32xf32>
    %275 = arith.mulf %270, %274 : vector<2x32xf32>
    %276 = vector.extract_strided_slice %5 {offsets = [0, 128], sizes = [2, 128], strides = [1, 1]} : vector<16x256xf32> to vector<2x128xf32>
    %cst_39 = arith.constant dense<0.000000e+00> : vector<2x128xf32>
    %277 = tpu.matmul %275, %150, %cst_39 {dimension_numbers = #tpu.dot_dimension_numbers<[1], [0], [0], [1], [0, 0, 1, 1], [], []>} : vector<2x32xf32>, vector<32x128xf32>, vector<2x128xf32> -> vector<2x128xf32>
    %278 = arith.addf %276, %277 : vector<2x128xf32>
    %279 = arith.negf %278 : vector<2x128xf32>
    %280 = math.exp %279 : vector<2x128xf32>
    %cst_40 = arith.constant 1.000000e+00 : f32
    %281 = vector.broadcast %cst_40 : f32 to vector<2x128xf32>
    %282 = arith.addf %281, %280 : vector<2x128xf32>
    %283 = arith.divf %281, %282 : vector<2x128xf32>
    %284 = math.tanh %278 : vector<2x128xf32>
    %285 = vector.extract_strided_slice %283 {offsets = [0, 0], sizes = [2, 32], strides = [1, 1]} : vector<2x128xf32> to vector<2x32xf32>
    %286 = vector.extract_strided_slice %283 {offsets = [0, 32], sizes = [2, 32], strides = [1, 1]} : vector<2x128xf32> to vector<2x32xf32>
    %287 = vector.extract_strided_slice %284 {offsets = [0, 64], sizes = [2, 32], strides = [1, 1]} : vector<2x128xf32> to vector<2x32xf32>
    %288 = vector.extract_strided_slice %283 {offsets = [0, 96], sizes = [2, 32], strides = [1, 1]} : vector<2x128xf32> to vector<2x32xf32>
    %289 = arith.mulf %286, %273 : vector<2x32xf32>
    %290 = arith.mulf %285, %287 : vector<2x32xf32>
    %291 = arith.addf %289, %290 : vector<2x32xf32>
    %292 = math.tanh %291 : vector<2x32xf32>
    %293 = arith.mulf %288, %292 : vector<2x32xf32>
    %294 = tpu.concatenate %23, %41, %59, %77, %95, %113, %131, %149 in 0 : vector<2x32xf32>, vector<2x32xf32>, vector<2x32xf32>, vector<2x32xf32>, vector<2x32xf32>, vector<2x32xf32>, vector<2x32xf32>, vector<2x32xf32> -> vector<16x32xf32>
    %295 = tpu.concatenate %293, %275, %257, %239, %221, %203, %185, %167 in 0 : vector<2x32xf32>, vector<2x32xf32>, vector<2x32xf32>, vector<2x32xf32>, vector<2x32xf32>, vector<2x32xf32>, vector<2x32xf32>, vector<2x32xf32> -> vector<16x32xf32>
    %296 = tpu.concatenate %294, %295 in 1 : vector<16x32xf32>, vector<16x32xf32> -> vector<16x64xf32>
    %c0_41 = arith.constant 0 : index
    %c0_42 = arith.constant 0 : index
    %297 = vector.load %arg5[%c0_41, %c0_42] : memref<64x256xf32, #tpu.memory_space<vmem>>, vector<64x256xf32>
    %cst_43 = arith.constant dense<0.000000e+00> : vector<16x256xf32>
    %298 = tpu.matmul %296, %297, %cst_43 {dimension_numbers = #tpu.dot_dimension_numbers<[1], [0], [0], [1], [0, 0, 1, 1], [], []>} : vector<16x64xf32>, vector<64x256xf32>, vector<16x256xf32> -> vector<16x256xf32>
    %c0_44 = arith.constant 0 : index
    %c0_45 = arith.constant 0 : index
    %299 = vector.load %arg8[%c0_44, %c0_45] : memref<1x256xf32, #tpu.memory_space<vmem>>, vector<1x256xf32>
    %300 = vector.broadcast %299 : vector<1x256xf32> to vector<16x256xf32>
    %301 = arith.addf %298, %300 : vector<16x256xf32>
    %c0_46 = arith.constant 0 : index
    %c0_47 = arith.constant 0 : index
    %302 = vector.load %arg6[%c0_46, %c0_47] : memref<32x128xf32, #tpu.memory_space<vmem>>, vector<32x128xf32>
    %cst_48 = arith.constant 0.000000e+00 : f32
    %303 = vector.broadcast %cst_48 : f32 to vector<2x32xf32>
    %304 = vector.extract_strided_slice %301 {offsets = [0, 0], sizes = [2, 128], strides = [1, 1]} : vector<16x256xf32> to vector<2x128xf32>
    %305 = arith.negf %304 : vector<2x128xf32>
    %306 = math.exp %305 : vector<2x128xf32>
    %cst_49 = arith.constant 1.000000e+00 : f32
    %307 = vector.broadcast %cst_49 : f32 to vector<2x128xf32>
    %308 = arith.addf %307, %306 : vector<2x128xf32>
    %309 = arith.divf %307, %308 : vector<2x128xf32>
    %310 = math.tanh %304 : vector<2x128xf32>
    %311 = vector.extract_strided_slice %309 {offsets = [0, 0], sizes = [2, 32], strides = [1, 1]} : vector<2x128xf32> to vector<2x32xf32>
    %312 = vector.extract_strided_slice %309 {offsets = [0, 32], sizes = [2, 32], strides = [1, 1]} : vector<2x128xf32> to vector<2x32xf32>
    %313 = vector.extract_strided_slice %310 {offsets = [0, 64], sizes = [2, 32], strides = [1, 1]} : vector<2x128xf32> to vector<2x32xf32>
    %314 = vector.extract_strided_slice %309 {offsets = [0, 96], sizes = [2, 32], strides = [1, 1]} : vector<2x128xf32> to vector<2x32xf32>
    %315 = arith.mulf %312, %303 : vector<2x32xf32>
    %316 = arith.mulf %311, %313 : vector<2x32xf32>
    %317 = arith.addf %315, %316 : vector<2x32xf32>
    %318 = math.tanh %317 : vector<2x32xf32>
    %319 = arith.mulf %314, %318 : vector<2x32xf32>
    %320 = vector.extract_strided_slice %301 {offsets = [2, 0], sizes = [2, 128], strides = [1, 1]} : vector<16x256xf32> to vector<2x128xf32>
    %cst_50 = arith.constant dense<0.000000e+00> : vector<2x128xf32>
    %321 = tpu.matmul %319, %302, %cst_50 {dimension_numbers = #tpu.dot_dimension_numbers<[1], [0], [0], [1], [0, 0, 1, 1], [], []>} : vector<2x32xf32>, vector<32x128xf32>, vector<2x128xf32> -> vector<2x128xf32>
    %322 = arith.addf %320, %321 : vector<2x128xf32>
    %323 = arith.negf %322 : vector<2x128xf32>
    %324 = math.exp %323 : vector<2x128xf32>
    %cst_51 = arith.constant 1.000000e+00 : f32
    %325 = vector.broadcast %cst_51 : f32 to vector<2x128xf32>
    %326 = arith.addf %325, %324 : vector<2x128xf32>
    %327 = arith.divf %325, %326 : vector<2x128xf32>
    %328 = math.tanh %322 : vector<2x128xf32>
    %329 = vector.extract_strided_slice %327 {offsets = [0, 0], sizes = [2, 32], strides = [1, 1]} : vector<2x128xf32> to vector<2x32xf32>
    %330 = vector.extract_strided_slice %327 {offsets = [0, 32], sizes = [2, 32], strides = [1, 1]} : vector<2x128xf32> to vector<2x32xf32>
    %331 = vector.extract_strided_slice %328 {offsets = [0, 64], sizes = [2, 32], strides = [1, 1]} : vector<2x128xf32> to vector<2x32xf32>
    %332 = vector.extract_strided_slice %327 {offsets = [0, 96], sizes = [2, 32], strides = [1, 1]} : vector<2x128xf32> to vector<2x32xf32>
    %333 = arith.mulf %330, %317 : vector<2x32xf32>
    %334 = arith.mulf %329, %331 : vector<2x32xf32>
    %335 = arith.addf %333, %334 : vector<2x32xf32>
    %336 = math.tanh %335 : vector<2x32xf32>
    %337 = arith.mulf %332, %336 : vector<2x32xf32>
    %338 = vector.extract_strided_slice %301 {offsets = [4, 0], sizes = [2, 128], strides = [1, 1]} : vector<16x256xf32> to vector<2x128xf32>
    %cst_52 = arith.constant dense<0.000000e+00> : vector<2x128xf32>
    %339 = tpu.matmul %337, %302, %cst_52 {dimension_numbers = #tpu.dot_dimension_numbers<[1], [0], [0], [1], [0, 0, 1, 1], [], []>} : vector<2x32xf32>, vector<32x128xf32>, vector<2x128xf32> -> vector<2x128xf32>
    %340 = arith.addf %338, %339 : vector<2x128xf32>
    %341 = arith.negf %340 : vector<2x128xf32>
    %342 = math.exp %341 : vector<2x128xf32>
    %cst_53 = arith.constant 1.000000e+00 : f32
    %343 = vector.broadcast %cst_53 : f32 to vector<2x128xf32>
    %344 = arith.addf %343, %342 : vector<2x128xf32>
    %345 = arith.divf %343, %344 : vector<2x128xf32>
    %346 = math.tanh %340 : vector<2x128xf32>
    %347 = vector.extract_strided_slice %345 {offsets = [0, 0], sizes = [2, 32], strides = [1, 1]} : vector<2x128xf32> to vector<2x32xf32>
    %348 = vector.extract_strided_slice %345 {offsets = [0, 32], sizes = [2, 32], strides = [1, 1]} : vector<2x128xf32> to vector<2x32xf32>
    %349 = vector.extract_strided_slice %346 {offsets = [0, 64], sizes = [2, 32], strides = [1, 1]} : vector<2x128xf32> to vector<2x32xf32>
    %350 = vector.extract_strided_slice %345 {offsets = [0, 96], sizes = [2, 32], strides = [1, 1]} : vector<2x128xf32> to vector<2x32xf32>
    %351 = arith.mulf %348, %335 : vector<2x32xf32>
    %352 = arith.mulf %347, %349 : vector<2x32xf32>
    %353 = arith.addf %351, %352 : vector<2x32xf32>
    %354 = math.tanh %353 : vector<2x32xf32>
    %355 = arith.mulf %350, %354 : vector<2x32xf32>
    %356 = vector.extract_strided_slice %301 {offsets = [6, 0], sizes = [2, 128], strides = [1, 1]} : vector<16x256xf32> to vector<2x128xf32>
    %cst_54 = arith.constant dense<0.000000e+00> : vector<2x128xf32>
    %357 = tpu.matmul %355, %302, %cst_54 {dimension_numbers = #tpu.dot_dimension_numbers<[1], [0], [0], [1], [0, 0, 1, 1], [], []>} : vector<2x32xf32>, vector<32x128xf32>, vector<2x128xf32> -> vector<2x128xf32>
    %358 = arith.addf %356, %357 : vector<2x128xf32>
    %359 = arith.negf %358 : vector<2x128xf32>
    %360 = math.exp %359 : vector<2x128xf32>
    %cst_55 = arith.constant 1.000000e+00 : f32
    %361 = vector.broadcast %cst_55 : f32 to vector<2x128xf32>
    %362 = arith.addf %361, %360 : vector<2x128xf32>
    %363 = arith.divf %361, %362 : vector<2x128xf32>
    %364 = math.tanh %358 : vector<2x128xf32>
    %365 = vector.extract_strided_slice %363 {offsets = [0, 0], sizes = [2, 32], strides = [1, 1]} : vector<2x128xf32> to vector<2x32xf32>
    %366 = vector.extract_strided_slice %363 {offsets = [0, 32], sizes = [2, 32], strides = [1, 1]} : vector<2x128xf32> to vector<2x32xf32>
    %367 = vector.extract_strided_slice %364 {offsets = [0, 64], sizes = [2, 32], strides = [1, 1]} : vector<2x128xf32> to vector<2x32xf32>
    %368 = vector.extract_strided_slice %363 {offsets = [0, 96], sizes = [2, 32], strides = [1, 1]} : vector<2x128xf32> to vector<2x32xf32>
    %369 = arith.mulf %366, %353 : vector<2x32xf32>
    %370 = arith.mulf %365, %367 : vector<2x32xf32>
    %371 = arith.addf %369, %370 : vector<2x32xf32>
    %372 = math.tanh %371 : vector<2x32xf32>
    %373 = arith.mulf %368, %372 : vector<2x32xf32>
    %374 = vector.extract_strided_slice %301 {offsets = [8, 0], sizes = [2, 128], strides = [1, 1]} : vector<16x256xf32> to vector<2x128xf32>
    %cst_56 = arith.constant dense<0.000000e+00> : vector<2x128xf32>
    %375 = tpu.matmul %373, %302, %cst_56 {dimension_numbers = #tpu.dot_dimension_numbers<[1], [0], [0], [1], [0, 0, 1, 1], [], []>} : vector<2x32xf32>, vector<32x128xf32>, vector<2x128xf32> -> vector<2x128xf32>
    %376 = arith.addf %374, %375 : vector<2x128xf32>
    %377 = arith.negf %376 : vector<2x128xf32>
    %378 = math.exp %377 : vector<2x128xf32>
    %cst_57 = arith.constant 1.000000e+00 : f32
    %379 = vector.broadcast %cst_57 : f32 to vector<2x128xf32>
    %380 = arith.addf %379, %378 : vector<2x128xf32>
    %381 = arith.divf %379, %380 : vector<2x128xf32>
    %382 = math.tanh %376 : vector<2x128xf32>
    %383 = vector.extract_strided_slice %381 {offsets = [0, 0], sizes = [2, 32], strides = [1, 1]} : vector<2x128xf32> to vector<2x32xf32>
    %384 = vector.extract_strided_slice %381 {offsets = [0, 32], sizes = [2, 32], strides = [1, 1]} : vector<2x128xf32> to vector<2x32xf32>
    %385 = vector.extract_strided_slice %382 {offsets = [0, 64], sizes = [2, 32], strides = [1, 1]} : vector<2x128xf32> to vector<2x32xf32>
    %386 = vector.extract_strided_slice %381 {offsets = [0, 96], sizes = [2, 32], strides = [1, 1]} : vector<2x128xf32> to vector<2x32xf32>
    %387 = arith.mulf %384, %371 : vector<2x32xf32>
    %388 = arith.mulf %383, %385 : vector<2x32xf32>
    %389 = arith.addf %387, %388 : vector<2x32xf32>
    %390 = math.tanh %389 : vector<2x32xf32>
    %391 = arith.mulf %386, %390 : vector<2x32xf32>
    %392 = vector.extract_strided_slice %301 {offsets = [10, 0], sizes = [2, 128], strides = [1, 1]} : vector<16x256xf32> to vector<2x128xf32>
    %cst_58 = arith.constant dense<0.000000e+00> : vector<2x128xf32>
    %393 = tpu.matmul %391, %302, %cst_58 {dimension_numbers = #tpu.dot_dimension_numbers<[1], [0], [0], [1], [0, 0, 1, 1], [], []>} : vector<2x32xf32>, vector<32x128xf32>, vector<2x128xf32> -> vector<2x128xf32>
    %394 = arith.addf %392, %393 : vector<2x128xf32>
    %395 = arith.negf %394 : vector<2x128xf32>
    %396 = math.exp %395 : vector<2x128xf32>
    %cst_59 = arith.constant 1.000000e+00 : f32
    %397 = vector.broadcast %cst_59 : f32 to vector<2x128xf32>
    %398 = arith.addf %397, %396 : vector<2x128xf32>
    %399 = arith.divf %397, %398 : vector<2x128xf32>
    %400 = math.tanh %394 : vector<2x128xf32>
    %401 = vector.extract_strided_slice %399 {offsets = [0, 0], sizes = [2, 32], strides = [1, 1]} : vector<2x128xf32> to vector<2x32xf32>
    %402 = vector.extract_strided_slice %399 {offsets = [0, 32], sizes = [2, 32], strides = [1, 1]} : vector<2x128xf32> to vector<2x32xf32>
    %403 = vector.extract_strided_slice %400 {offsets = [0, 64], sizes = [2, 32], strides = [1, 1]} : vector<2x128xf32> to vector<2x32xf32>
    %404 = vector.extract_strided_slice %399 {offsets = [0, 96], sizes = [2, 32], strides = [1, 1]} : vector<2x128xf32> to vector<2x32xf32>
    %405 = arith.mulf %402, %389 : vector<2x32xf32>
    %406 = arith.mulf %401, %403 : vector<2x32xf32>
    %407 = arith.addf %405, %406 : vector<2x32xf32>
    %408 = math.tanh %407 : vector<2x32xf32>
    %409 = arith.mulf %404, %408 : vector<2x32xf32>
    %410 = vector.extract_strided_slice %301 {offsets = [12, 0], sizes = [2, 128], strides = [1, 1]} : vector<16x256xf32> to vector<2x128xf32>
    %cst_60 = arith.constant dense<0.000000e+00> : vector<2x128xf32>
    %411 = tpu.matmul %409, %302, %cst_60 {dimension_numbers = #tpu.dot_dimension_numbers<[1], [0], [0], [1], [0, 0, 1, 1], [], []>} : vector<2x32xf32>, vector<32x128xf32>, vector<2x128xf32> -> vector<2x128xf32>
    %412 = arith.addf %410, %411 : vector<2x128xf32>
    %413 = arith.negf %412 : vector<2x128xf32>
    %414 = math.exp %413 : vector<2x128xf32>
    %cst_61 = arith.constant 1.000000e+00 : f32
    %415 = vector.broadcast %cst_61 : f32 to vector<2x128xf32>
    %416 = arith.addf %415, %414 : vector<2x128xf32>
    %417 = arith.divf %415, %416 : vector<2x128xf32>
    %418 = math.tanh %412 : vector<2x128xf32>
    %419 = vector.extract_strided_slice %417 {offsets = [0, 0], sizes = [2, 32], strides = [1, 1]} : vector<2x128xf32> to vector<2x32xf32>
    %420 = vector.extract_strided_slice %417 {offsets = [0, 32], sizes = [2, 32], strides = [1, 1]} : vector<2x128xf32> to vector<2x32xf32>
    %421 = vector.extract_strided_slice %418 {offsets = [0, 64], sizes = [2, 32], strides = [1, 1]} : vector<2x128xf32> to vector<2x32xf32>
    %422 = vector.extract_strided_slice %417 {offsets = [0, 96], sizes = [2, 32], strides = [1, 1]} : vector<2x128xf32> to vector<2x32xf32>
    %423 = arith.mulf %420, %407 : vector<2x32xf32>
    %424 = arith.mulf %419, %421 : vector<2x32xf32>
    %425 = arith.addf %423, %424 : vector<2x32xf32>
    %426 = math.tanh %425 : vector<2x32xf32>
    %427 = arith.mulf %422, %426 : vector<2x32xf32>
    %428 = vector.extract_strided_slice %301 {offsets = [14, 0], sizes = [2, 128], strides = [1, 1]} : vector<16x256xf32> to vector<2x128xf32>
    %cst_62 = arith.constant dense<0.000000e+00> : vector<2x128xf32>
    %429 = tpu.matmul %427, %302, %cst_62 {dimension_numbers = #tpu.dot_dimension_numbers<[1], [0], [0], [1], [0, 0, 1, 1], [], []>} : vector<2x32xf32>, vector<32x128xf32>, vector<2x128xf32> -> vector<2x128xf32>
    %430 = arith.addf %428, %429 : vector<2x128xf32>
    %431 = arith.negf %430 : vector<2x128xf32>
    %432 = math.exp %431 : vector<2x128xf32>
    %cst_63 = arith.constant 1.000000e+00 : f32
    %433 = vector.broadcast %cst_63 : f32 to vector<2x128xf32>
    %434 = arith.addf %433, %432 : vector<2x128xf32>
    %435 = arith.divf %433, %434 : vector<2x128xf32>
    %436 = math.tanh %430 : vector<2x128xf32>
    %437 = vector.extract_strided_slice %435 {offsets = [0, 0], sizes = [2, 32], strides = [1, 1]} : vector<2x128xf32> to vector<2x32xf32>
    %438 = vector.extract_strided_slice %435 {offsets = [0, 32], sizes = [2, 32], strides = [1, 1]} : vector<2x128xf32> to vector<2x32xf32>
    %439 = vector.extract_strided_slice %436 {offsets = [0, 64], sizes = [2, 32], strides = [1, 1]} : vector<2x128xf32> to vector<2x32xf32>
    %440 = vector.extract_strided_slice %435 {offsets = [0, 96], sizes = [2, 32], strides = [1, 1]} : vector<2x128xf32> to vector<2x32xf32>
    %441 = arith.mulf %438, %425 : vector<2x32xf32>
    %442 = arith.mulf %437, %439 : vector<2x32xf32>
    %443 = arith.addf %441, %442 : vector<2x32xf32>
    %444 = math.tanh %443 : vector<2x32xf32>
    %445 = arith.mulf %440, %444 : vector<2x32xf32>
    %446 = vector.extract_strided_slice %301 {offsets = [14, 128], sizes = [2, 128], strides = [1, 1]} : vector<16x256xf32> to vector<2x128xf32>
    %cst_64 = arith.constant 0.000000e+00 : f32
    %447 = vector.broadcast %cst_64 : f32 to vector<2x32xf32>
    %448 = arith.negf %446 : vector<2x128xf32>
    %449 = math.exp %448 : vector<2x128xf32>
    %cst_65 = arith.constant 1.000000e+00 : f32
    %450 = vector.broadcast %cst_65 : f32 to vector<2x128xf32>
    %451 = arith.addf %450, %449 : vector<2x128xf32>
    %452 = arith.divf %450, %451 : vector<2x128xf32>
    %453 = math.tanh %446 : vector<2x128xf32>
    %454 = vector.extract_strided_slice %452 {offsets = [0, 0], sizes = [2, 32], strides = [1, 1]} : vector<2x128xf32> to vector<2x32xf32>
    %455 = vector.extract_strided_slice %452 {offsets = [0, 32], sizes = [2, 32], strides = [1, 1]} : vector<2x128xf32> to vector<2x32xf32>
    %456 = vector.extract_strided_slice %453 {offsets = [0, 64], sizes = [2, 32], strides = [1, 1]} : vector<2x128xf32> to vector<2x32xf32>
    %457 = vector.extract_strided_slice %452 {offsets = [0, 96], sizes = [2, 32], strides = [1, 1]} : vector<2x128xf32> to vector<2x32xf32>
    %458 = arith.mulf %455, %447 : vector<2x32xf32>
    %459 = arith.mulf %454, %456 : vector<2x32xf32>
    %460 = arith.addf %458, %459 : vector<2x32xf32>
    %461 = math.tanh %460 : vector<2x32xf32>
    %462 = arith.mulf %457, %461 : vector<2x32xf32>
    %463 = tpu.concatenate %445, %462 in 1 : vector<2x32xf32>, vector<2x32xf32> -> vector<2x64xf32>
    %c0_66 = arith.constant 0 : index
    %c0_67 = arith.constant 0 : index
    %464 = vector.load %arg9[%c0_66, %c0_67] : memref<64x32xf32, #tpu.memory_space<vmem>>, vector<64x32xf32>
    %c0_68 = arith.constant 0 : index
    %c0_69 = arith.constant 0 : index
    %465 = vector.load %arg10[%c0_68, %c0_69] : memref<1x32xf32, #tpu.memory_space<vmem>>, vector<1x32xf32>
    %cst_70 = arith.constant dense<0.000000e+00> : vector<2x32xf32>
    %466 = tpu.matmul %463, %464, %cst_70 {dimension_numbers = #tpu.dot_dimension_numbers<[1], [0], [0], [1], [0, 0, 1, 1], [], []>} : vector<2x64xf32>, vector<64x32xf32>, vector<2x32xf32> -> vector<2x32xf32>
    %467 = vector.broadcast %465 : vector<1x32xf32> to vector<2x32xf32>
    %468 = arith.addf %466, %467 : vector<2x32xf32>
    %cst_71 = arith.constant 0.000000e+00 : f32
    %469 = vector.broadcast %cst_71 : f32 to vector<2x32xf32>
    %470 = arith.maximumf %468, %469 : vector<2x32xf32>
    %c0_72 = arith.constant 0 : index
    %c0_73 = arith.constant 0 : index
    %471 = vector.load %arg11[%c0_72, %c0_73] : memref<32x1xf32, #tpu.memory_space<vmem>>, vector<32x1xf32>
    %c0_74 = arith.constant 0 : index
    %c0_75 = arith.constant 0 : index
    %472 = vector.load %arg12[%c0_74, %c0_75] : memref<1x1xf32, #tpu.memory_space<vmem>>, vector<1x1xf32>
    %cst_76 = arith.constant dense<0.000000e+00> : vector<2x1xf32>
    %473 = tpu.matmul %470, %471, %cst_76 {dimension_numbers = #tpu.dot_dimension_numbers<[1], [0], [0], [1], [0, 0, 1, 1], [], []>} : vector<2x32xf32>, vector<32x1xf32>, vector<2x1xf32> -> vector<2x1xf32>
    %474 = vector.broadcast %472 : vector<1x1xf32> to vector<2x1xf32>
    %475 = arith.addf %473, %474 : vector<2x1xf32>
    %c0_77 = arith.constant 0 : index
    %c0_78 = arith.constant 0 : index
    %476 = vector.load %arg13[%c0_77, %c0_78] : memref<2x1xf32, #tpu.memory_space<vmem>>, vector<2x1xf32>
    tpu.vector_store %arg13[%c0_77, %c0_78], %475 {strides = array<i32>} : memref<2x1xf32, #tpu.memory_space<vmem>>, vector<2x1xf32>,
    return
  }
}

</mosaic_0001>

<bundles_post_ra>
// kernel: tpu_custom_call.1
= control target key start
LH: loop header
LB: loop body
LE: loop exit
PB: predicated region body
PF: predicated region fallthrough
CT: control target
= control target key end

     0   :  { %s2871_s0 = inlined_call_operand.vmem [shape: f32[16,4], index: 0, kind: input, shape index: {}]   ;;  %s2872_s1 = inlined_call_operand.vmem [shape: f32[4,256], index: 1, kind: input, shape index: {}]   ;;  %s2873_s2 = inlined_call_operand.vmem [shape: f32[32,128], index: 2, kind: input, shape index: {}]   ;;  %s2874_s3 = inlined_call_operand.vmem [shape: f32[32,128], index: 3, kind: input, shape index: {}]   ;;  %s2875_s4 = inlined_call_operand.vmem [shape: f32[1,256], index: 4, kind: input, shape index: {}]   ;;  %s2876_s5 = inlined_call_operand.hbm [shape: f32[64,256], index: 5, kind: input, shape index: {}]   ;;  %s2877_s6 = inlined_call_operand.vmem [shape: f32[32,128], index: 6, kind: input, shape index: {}]   ;;  %s2878_s7 = inlined_call_operand.hbm [shape: f32[32,128], index: 7, kind: input, shape index: {}]   ;;  %s2879_s8 = inlined_call_operand.vmem [shape: f32[1,256], index: 8, kind: input, shape index: {}]   ;;  %s2880_s9 = inlined_call_operand.vmem [shape: f32[64,32], index: 9, kind: input, shape index: {}]   ;;  %s2881_s10 = inlined_call_operand.vmem [shape: f32[1,32], index: 10, kind: input, shape index: {}]   ;;  %s2882_s11 = inlined_call_operand.vmem [shape: f32[32,1], index: 11, kind: input, shape index: {}]   ;;  %s2883_s12 = inlined_call_operand.<no memory space> [shape: f32[1,1], index: 12, kind: input, shape index: {}]   ;;  %s2884_s13 = inlined_call_operand.vmem [shape: f32[2,1], index: 13, kind: output, shape index: {}]  }
   0x1   :  { %v18_v0 = vstv %s2883_s12 }
   0x2   :  { %19 = vst [vmem:[#allocation2] sm:$0x1] %v18_v0 }
   0x3   :  { %20 = vsyncpa [#allocation4], 0  ;;  %s36_s29 = sshll.u32 %s2876_s5, 4  ;;  %s37_s29 = int_to_ptr.hbm [resolvable:$true] %s36_s29 }
   0x4   :  { %21 = vsyncpa [#allocation6], 0  ;;  %s2274_s30 = smov [#allocation3]   ;;  %s51_s17 = sshll.u32 %s2878_s7, 4  ;;  %s52_s17 = int_to_ptr.hbm [resolvable:$true] %s51_s17 }
   0x5   :  { %s38_s14 = sshll.u32 %s2274_s30, 4  ;;  %s2275_s18 = smov 256   ;;  %s39_s14 = int_to_ptr.vmem [resolvable:$true] %s38_s14 }
   0x6   :  { %s2276_s19 = smov 16   ;;  %s2277_s12 = smov [#allocation5]  }
   0x7   :  { %44 = dma.hbm_to_vmem [thread:$0]  %s37_s29, 2048, %s39_s14, [#allocation4], %s2275_s18, %s2275_s18, %s2276_s19  }
   0x8   :  { %s53_s20 = sshll.u32 %s2277_s12, 4  ;;  %s2278_s21 = smov 128   ;;  %s54_s20 = int_to_ptr.vmem [resolvable:$true] %s53_s20 }
   0x9   :  { %s2279_s22 = smov 8  }
   0xa   :  { %59 = dma.hbm_to_vmem [thread:$0]  %s52_s17, 512, %s54_s20, [#allocation6], %s2278_s21, %s2278_s21, %s2279_s22  }
   0xb   :  { %2270 = dma.done.wait [#allocation4], 2048  }
   0xc   :  { %2271 = vsyncadd [#allocation4], 4294965248 }
   0xd   :  { %2272 = dma.done.wait [#allocation6], 512  }
   0xe   :  { %2273 = vsyncadd [#allocation6], 4294966784  ;;  %v80_v1 = vld [vmem:[%s2872_s1] sm:$0xff]  ;;  %vm98_vm0 = vcmask 1043456   ;;  %vm91_vm1 = vcmask 31744   ;;  %s2280_s1 = smov 64  }
   0xf   :  { %88 = vst [vmem:[#allocation1] ss:$2 sm:$0xff] %v80_v1  ;;  %v2367_v2 = vld [vmem:[%s2871_s0] sm:$0xff]  ;;  %v2393_v28 = vld [vmem:[%s2873_s2 + $0x18] sm:$0xff]  ;;  %v2398_v29 = vld [vmem:[%s2873_s2 + $0x10] sm:$0xff]  ;;  %vm193_vm6 = vcmask 261120  }
  0x10   :  { %v2375_v4 = vld [vmem:[%s2875_s4] sm:$0x3]  ;;  %s2281_s4 = smov 32   ;;  %208 = vmatpush.msra.mxu2 %v2393_v28  ;;  %278 = vmatpush.msra.mxu3 %v2393_v28  ;;  %v2405_v30 = vld [vmem:[%s2873_s2 + $0x8] sm:$0xff]  ;;  %vm1200_vm15 = vcmask 1041408  }
  0x11   :  { %v83_v5 = vperm.slane %v2375_v4, 0  ;;  %v2413_v31 = vld [vmem:[%s2873_s2] sm:$0xff] }
  0x12   :  { %209 = vmatpush.msra.mxu2 %v2398_v29  ;;  %279 = vmatpush.msra.mxu3 %v2398_v29 }
  0x14   :  { %210 = vmatpush.msra.mxu2 %v2405_v30  ;;  %280 = vmatpush.msra.mxu3 %v2405_v30 }
  0x16   :  { %v89_v3 = vld.sshfl [vmem:[#allocation1] sm:$0xff pattern:$0x75316420]  ;;  %211 = vmatpush.msra.mxu2 %v2413_v31  ;;  %281 = vmatpush.msra.mxu3 %v2413_v31 }
  0x17   :  { %1954 = vmatpush.msk.msra.mxu0 %vm98_vm0, %v89_v3 }
  0x18   :  { %1955 = vmatmul.msk.f32.vlgmr.msra.gmra.mxu0 %vm91_vm1, %v2367_v2  ;;  %348 = vmatpush.msrb.mxu2 %v2393_v28 }
  0x19   :  { %484 = vmatpush.msrb.mxu0 %v2393_v28  ;;  %418 = vmatpush.msrb.mxu3 %v2393_v28 }
  0x1a   :  { %349 = vmatpush.msrb.mxu2 %v2398_v29 }
  0x1b   :  { %485 = vmatpush.msrb.mxu0 %v2398_v29  ;;  %419 = vmatpush.msrb.mxu3 %v2398_v29 }
  0x1c   :  { %350 = vmatpush.msrb.mxu2 %v2405_v30 }
  0x1d   :  { %486 = vmatpush.msrb.mxu0 %v2405_v30  ;;  %420 = vmatpush.msrb.mxu3 %v2405_v30 }
  0x1e   :  { %351 = vmatpush.msrb.mxu2 %v2413_v31 }
  0x1f   :  { %487 = vmatpush.msrb.mxu0 %v2413_v31  ;;  %421 = vmatpush.msrb.mxu3 %v2413_v31 }
  0x95   :  { %v120_v6 = vpop.f32.mrf.mxu0 }
  0x96   :  { %v2380_v7 = vadd.f32 %v120_v6, %v83_v5 }
  0x98   :  { %2022 = vtanh.f32 %v2380_v7  ;;  %v1960_v9 = vmul.f32 -1.442695, %v2380_v7 }
  0x9a   :  { %2024 = vpow2.f32 %v1960_v9 }
  0x9e   :  { %v2023_v8 = vpop.eup %2022 }
  0x9f   :  { %175 = vrot.lane.b32.xlu0 %v2023_v8, %s2280_s1 }
  0xa0   :  { %v2025_v10 = vpop.eup %2024 }
  0xa1   :  { %v156_v11 = vadd.f32 1.0, %v2025_v10 }
  0xa3   :  { %2026 = vrcp.f32 %v156_v11  ;;  %v168_v17 = vand.u32 2147483648, %v156_v11  ;;  %vm162_vm3 = vweird.f32 %v156_v11  ;;  %v166_v18 = vand.u32 2147483647, %v156_v11 }
  0xa5   :  { %v169_v20 = vor.u32 1.1754944e-38, %v168_v17  ;;  %vm167_vm5 = vcmp.eq.f32.partialorder %v166_v18, 8.507059e+37 }
  0xa9   :  { %v2027_v12 = vpop.eup %2026 }
  0xaa   :  { %v158_v13 = vmul.f32 %v2027_v12, %v156_v11  ;;  %vm163_vm2 = vweird.f32 %v2027_v12 }
  0xab   :  { %vm164_vm4 = vmor %vm162_vm3, %vm163_vm2 }
  0xac   :  { %v159_v14 = vsub.f32 1.0, %v158_v13 }
  0xae   :  { %v160_v15 = vmul.f32 %v2027_v12, %v159_v14 }
  0xb0   :  { %v161_v16 = vadd.f32 %v2027_v12, %v160_v15 }
  0xb2   :  { %v165_v19 = vsel %vm164_vm4, %v2027_v12, %v161_v16 }
  0xb3   :  { %v170_v22 = vsel %vm167_vm5, %v169_v20, %v165_v19 }
  0xb4   :  { %v173_v24 = vmul.f32 0.0, %v170_v22 }
 0x111   :  { %v176_v21 = vpop.permute.xlu0 %175 }
 0x112   :  { %v178_v23 = vmul.f32 %v176_v21, %v170_v22 }
 0x114   :  { %180 = vrot.lane.b32.xlu0 %v178_v23, %s2281_s4  ;;  %v79_v23 = vld [vmem:[%s2871_s0 + $0x8] sm:$0xff] }
 0x115   :  { %1956 = vmatmul.msk.f32.gmra.mxu0 %vm91_vm1, %v79_v23 }
 0x186   :  { %v181_v25 = vpop.permute.xlu0 %180 }
 0x187   :  { %v2386_v26 = vadd.f32 %v181_v25, %v173_v24 }
 0x189   :  { %2028 = vtanh.f32 %v2386_v26  ;;  %v241_v54 = vrot.slane %v2386_v26, 6 }
 0x18f   :  { %v2029_v27 = vpop.eup %2028 }
 0x190   :  { %186 = vrot.lane.b32.xlu1 %v2029_v27, %s2280_s1 }
 0x202   :  { %v187_v32 = vpop.permute.xlu1 %186 }
 0x203   :  { %v2430_v33 = vmul.f32 %v187_v32, %v170_v22  ;;  %v90_v22 = vld.sshfl [vmem:[#allocation1 + $0x8] sm:$0xff pattern:$0x75316420] }
 0x204   :  { %1957 = vmatpush.msk.msra.mxu1 %vm98_vm0, %v90_v22 }
 0x205   :  { %191 = vrot.lane.b32.xlu1 %v2430_v33, %s2281_s4  ;;  %1958 = vmatmul.msk.f32.vlgmr.msra.gmra.mxu1 %vm91_vm1, %v2367_v2 }
 0x206   :  { %554 = vmatpush.msrb.mxu1 %v2393_v28 }
 0x208   :  { %555 = vmatpush.msrb.mxu1 %v2398_v29 }
 0x20a   :  { %556 = vmatpush.msrb.mxu1 %v2405_v30 }
 0x20c   :  { %557 = vmatpush.msrb.mxu1 %v2413_v31 }
 0x20d   :  { %1959 = vmatmul.msk.f32.gmra.mxu1 %vm91_vm1, %v79_v23 }
 0x277   :  { %v192_v34 = vpop.permute.xlu1 %191 }
 0x278   :  { %1961 = vmatmul.msk.f32.vlgmr.msra.gmra.mxu2 %vm193_vm6, %v192_v34  ;;  %v84_v34 = vperm.slane %v2375_v4, 1 }
 0x279   :  { %624 = vmatpush.msra.mxu2 %v2393_v28 }
 0x27b   :  { %625 = vmatpush.msra.mxu2 %v2398_v29 }
 0x27d   :  { %626 = vmatpush.msra.mxu2 %v2405_v30 }
 0x27f   :  { %627 = vmatpush.msra.mxu2 %v2413_v31 }
 0x2fb   :  { %v213_v35 = vpop.f32.mrf.mxu2 }
 0x2fc   :  { %v217_v36 = vrot.slane %v213_v35, 6  ;;  %v143_v35 = vpop.f32.mrf.mxu1 }
 0x2fe   :  { %v219_v37 = vadd.f32 %v217_v36, %v2380_v7  ;;  %v2472_v36 = vadd.f32 %v143_v35, %v84_v34  ;;  %v123_v35 = vpop.f32.mrf.mxu0 }
 0x300   :  { %2030 = vtanh.f32 %v219_v37  ;;  %v1962_v39 = vmul.f32 -1.442695, %v219_v37 }
 0x302   :  { %2032 = vpow2.f32 %v1962_v39 }
 0x304   :  { %v146_v37 = vpop.f32.mrf.mxu1 }
 0x306   :  { %v2031_v38 = vpop.eup %2030 }
 0x307   :  { %245 = vrot.lane.b32.xlu2 %v2031_v38, %s2280_s1  ;;  %v2474_v38 = vadd.f32 %v146_v37, %v84_v34  ;;  %v2546_v37 = vadd.f32 %v123_v35, %v83_v5 }
 0x308   :  { %v2033_v40 = vpop.eup %2032 }
 0x309   :  { %v223_v41 = vadd.f32 1.0, %v2033_v40  ;;  %v1975_v40 = vmul.f32 -1.442695, %v2474_v38 }
 0x30b   :  { %2034 = vrcp.f32 %v223_v41  ;;  %v235_v47 = vand.u32 2147483648, %v223_v41  ;;  %vm229_vm8 = vweird.f32 %v223_v41  ;;  %v233_v48 = vand.u32 2147483647, %v223_v41 }
 0x30d   :  { %v236_v50 = vor.u32 1.1754944e-38, %v235_v47  ;;  %vm234_vm10 = vcmp.eq.f32.partialorder %v233_v48, 8.507059e+37 }
 0x311   :  { %v2035_v42 = vpop.eup %2034 }
 0x312   :  { %v225_v43 = vmul.f32 %v2035_v42, %v223_v41  ;;  %vm230_vm7 = vweird.f32 %v2035_v42 }
 0x313   :  { %vm231_vm9 = vmor %vm229_vm8, %vm230_vm7 }
 0x314   :  { %v226_v44 = vsub.f32 1.0, %v225_v43 }
 0x316   :  { %v227_v45 = vmul.f32 %v2035_v42, %v226_v44 }
 0x318   :  { %v228_v46 = vadd.f32 %v2035_v42, %v227_v45 }
 0x31a   :  { %v232_v49 = vsel %vm231_vm9, %v2035_v42, %v228_v46 }
 0x31b   :  { %v237_v52 = vsel %vm234_vm10, %v236_v50, %v232_v49  ;;  %vm1203_vm10 = vcmask 1045504  }
 0x31c   :  { %v243_v55 = vmul.f32 %v241_v54, %v237_v52 }
 0x361   :  { %v246_v51 = vpop.permute.xlu2 %245 }
 0x362   :  { %v248_v53 = vmul.f32 %v246_v51, %v237_v52 }
 0x364   :  { %250 = vrot.lane.b32.xlu2 %v248_v53, %s2281_s4 }
 0x3be   :  { %v251_v56 = vpop.permute.xlu2 %250 }
 0x3bf   :  { %v253_v57 = vadd.f32 %v251_v56, %v243_v55 }
 0x3c1   :  { %2036 = vtanh.f32 %v253_v57  ;;  %v311_v24 = vrot.slane %v253_v57, 6 }
 0x3c7   :  { %v2037_v58 = vpop.eup %2036 }
 0x3c8   :  { %256 = vrot.lane.b32.xlu0 %v2037_v58, %s2280_s1 }
 0x43a   :  { %v257_v59 = vpop.permute.xlu0 %256 }
 0x43b   :  { %v259_v60 = vmul.f32 %v257_v59, %v237_v52 }
 0x43d   :  { %v261_v61 = vrot.slane %v259_v60, 2  ;;  %v1201_v29 = vsel %vm1200_vm15, %v2430_v33, %v259_v60 }
 0x43f   :  { %262 = vrot.lane.b32.xlu1 %v261_v61, %s2281_s4 }
 0x4b1   :  { %v263_v62 = vpop.permute.xlu1 %262 }
 0x4b2   :  { %1963 = vmatmul.msk.f32.vlgmr.msra.gmra.mxu3 %vm193_vm6, %v263_v62 }
 0x535   :  { %v283_v63 = vpop.f32.mrf.mxu3 }
 0x536   :  { %v287_v0 = vrot.slane %v283_v63, 4 }
 0x538   :  { %v289_v1 = vadd.f32 %v287_v0, %v2380_v7 }
 0x53a   :  { %2038 = vtanh.f32 %v289_v1  ;;  %v1964_v6 = vmul.f32 -1.442695, %v289_v1 }
 0x53c   :  { %2040 = vpow2.f32 %v1964_v6 }
 0x540   :  { %v2039_v3 = vpop.eup %2038 }
 0x541   :  { %315 = vrot.lane.b32.xlu2 %v2039_v3, %s2280_s1 }
 0x542   :  { %v2041_v8 = vpop.eup %2040 }
 0x543   :  { %v293_v9 = vadd.f32 1.0, %v2041_v8 }
 0x545   :  { %2042 = vrcp.f32 %v293_v9  ;;  %v305_v15 = vand.u32 2147483648, %v293_v9  ;;  %vm299_vm12 = vweird.f32 %v293_v9  ;;  %v303_v16 = vand.u32 2147483647, %v293_v9 }
 0x547   :  { %v306_v18 = vor.u32 1.1754944e-38, %v305_v15  ;;  %vm304_vm14 = vcmp.eq.f32.partialorder %v303_v16, 8.507059e+37 }
 0x54b   :  { %v2043_v10 = vpop.eup %2042 }
 0x54c   :  { %v295_v11 = vmul.f32 %v2043_v10, %v293_v9  ;;  %vm300_vm11 = vweird.f32 %v2043_v10 }
 0x54d   :  { %vm301_vm13 = vmor %vm299_vm12, %vm300_vm11 }
 0x54e   :  { %v296_v12 = vsub.f32 1.0, %v295_v11 }
 0x550   :  { %v297_v13 = vmul.f32 %v2043_v10, %v296_v12 }
 0x552   :  { %v298_v14 = vadd.f32 %v2043_v10, %v297_v13 }
 0x554   :  { %v302_v17 = vsel %vm301_vm13, %v2043_v10, %v298_v14 }
 0x555   :  { %v307_v20 = vsel %vm304_vm14, %v306_v18, %v302_v17 }
 0x556   :  { %v313_v25 = vmul.f32 %v311_v24, %v307_v20 }
 0x59b   :  { %v316_v19 = vpop.permute.xlu2 %315 }
 0x59c   :  { %v318_v21 = vmul.f32 %v316_v19, %v307_v20 }
 0x59e   :  { %320 = vrot.lane.b32.xlu0 %v318_v21, %s2281_s4 }
 0x610   :  { %v321_v26 = vpop.permute.xlu0 %320 }
 0x611   :  { %v2461_v27 = vadd.f32 %v321_v26, %v313_v25 }
 0x613   :  { %2044 = vtanh.f32 %v2461_v27  ;;  %v381_v17 = vrot.slane %v2461_v27, 6 }
 0x614   :  { %2046 = vtanh.f32 %v2474_v38 }
 0x615   :  { %2048 = vpow2.f32 %v1975_v40 }
 0x619   :  { %v2045_v32 = vpop.eup %2044 }
 0x61a   :  { %326 = vrot.lane.b32.xlu1 %v2045_v32, %s2280_s1  ;;  %v2047_v39 = vpop.eup %2046 }
 0x61b   :  { %v2049_v41 = vpop.eup %2048 }
 0x61c   :  { %v683_v42 = vadd.f32 1.0, %v2049_v41 }
 0x61e   :  { %2050 = vrcp.f32 %v683_v42  ;;  %vm689_vm1 = vweird.f32 %v683_v42  ;;  %v695_v50 = vand.u32 2147483648, %v683_v42  ;;  %v693_v52 = vand.u32 2147483647, %v683_v42 }
 0x620   :  { %v696_v53 = vor.u32 1.1754944e-38, %v695_v50  ;;  %vm694_vm4 = vcmp.eq.f32.partialorder %v693_v52, 8.507059e+37 }
 0x622   :  { %702 = vrot.lane.b32.xlu1 %v2047_v39, %s2280_s1 }
 0x624   :  { %v2051_v43 = vpop.eup %2050 }
 0x625   :  { %v685_v44 = vmul.f32 %v2051_v43, %v683_v42  ;;  %vm690_vm2 = vweird.f32 %v2051_v43 }
 0x626   :  { %vm691_vm3 = vmor %vm689_vm1, %vm690_vm2 }
 0x627   :  { %v686_v45 = vsub.f32 1.0, %v685_v44 }
 0x629   :  { %v687_v48 = vmul.f32 %v2051_v43, %v686_v45 }
 0x62b   :  { %v688_v51 = vadd.f32 %v2051_v43, %v687_v48 }
 0x62d   :  { %v692_v54 = vsel %vm691_vm3, %v2051_v43, %v688_v51 }
 0x62e   :  { %v697_v56 = vsel %vm694_vm4, %v696_v53, %v692_v54 }
 0x62f   :  { %v700_v13 = vmul.f32 0.0, %v697_v56 }
 0x68c   :  { %v327_v2 = vpop.permute.xlu1 %326 }
 0x68d   :  { %v329_v28 = vmul.f32 %v327_v2, %v307_v20  ;;  %v2505_v2 = vld [vmem:[%s2874_s3 + $0x18] sm:$0xff] }
 0x68e   :  { %735 = vmatpush.msra.mxu3 %v2505_v2  ;;  %805 = vmatpush.msra.mxu0 %v2505_v2 }
 0x68f   :  { %v331_v30 = vrot.slane %v329_v28, 4  ;;  %v2468_v31 = vsel %vm98_vm0, %v1201_v29, %v329_v28  ;;  %v2510_v28 = vld [vmem:[%s2874_s3 + $0x10] sm:$0xff]  ;;  %v2517_v29 = vld [vmem:[%s2874_s3 + $0x8] sm:$0xff]  ;;  %875 = vmatpush.msra.mxu1 %v2505_v2 }
 0x690   :  { %736 = vmatpush.msra.mxu3 %v2510_v28  ;;  %806 = vmatpush.msra.mxu0 %v2510_v28 }
 0x691   :  { %332 = vrot.lane.b32.xlu2 %v331_v30, %s2281_s4  ;;  %v2526_v30 = vld [vmem:[%s2874_s3] sm:$0xff]  ;;  %876 = vmatpush.msra.mxu1 %v2510_v28 }
 0x692   :  { %737 = vmatpush.msra.mxu3 %v2517_v29  ;;  %807 = vmatpush.msra.mxu0 %v2517_v29 }
 0x693   :  { %877 = vmatpush.msra.mxu1 %v2517_v29 }
 0x694   :  { %v703_v57 = vpop.permute.xlu1 %702  ;;  %738 = vmatpush.msra.mxu3 %v2526_v30  ;;  %808 = vmatpush.msra.mxu0 %v2526_v30 }
 0x695   :  { %v705_v58 = vmul.f32 %v703_v57, %v697_v56  ;;  %878 = vmatpush.msra.mxu1 %v2526_v30 }
 0x6eb   :  { %v333_v33 = vpop.permute.xlu2 %332 }
 0x6ec   :  { %1965 = vmatmul.msk.f32.vlgmr.msrb.gmra.mxu2 %vm193_vm6, %v333_v33 }
 0x6ed   :  { %941 = vmatpush.msrb.mxu2 %v2505_v2 }
 0x6ef   :  { %942 = vmatpush.msrb.mxu2 %v2510_v28 }
 0x6f1   :  { %943 = vmatpush.msrb.mxu2 %v2517_v29 }
 0x6f3   :  { %944 = vmatpush.msrb.mxu2 %v2526_v30 }
 0x76f   :  { %v353_v46 = vpop.f32.mrf.mxu2 }
 0x770   :  { %v357_v47 = vrot.slane %v353_v46, 2 }
 0x772   :  { %v359_v49 = vadd.f32 %v357_v47, %v2380_v7 }
 0x774   :  { %2052 = vtanh.f32 %v359_v49  ;;  %v1966_v59 = vmul.f32 -1.442695, %v359_v49 }
 0x776   :  { %2054 = vpow2.f32 %v1966_v59 }
 0x77a   :  { %v2053_v55 = vpop.eup %2052 }
 0x77b   :  { %385 = vrot.lane.b32.xlu0 %v2053_v55, %s2280_s1 }
 0x77c   :  { %v2055_v7 = vpop.eup %2054 }
 0x77d   :  { %v363_v60 = vadd.f32 1.0, %v2055_v7 }
 0x77f   :  { %2056 = vrcp.f32 %v363_v60  ;;  %v375_v3 = vand.u32 2147483648, %v363_v60  ;;  %vm369_vm7 = vweird.f32 %v363_v60  ;;  %v373_v6 = vand.u32 2147483647, %v363_v60 }
 0x781   :  { %v376_v9 = vor.u32 1.1754944e-38, %v375_v3  ;;  %vm374_vm9 = vcmp.eq.f32.partialorder %v373_v6, 8.507059e+37 }
 0x783   :  { %707 = vrot.lane.b32.xlu0 %v705_v58, %s2281_s4 }
 0x785   :  { %v2057_v61 = vpop.eup %2056 }
 0x786   :  { %v365_v62 = vmul.f32 %v2057_v61, %v363_v60  ;;  %vm370_vm5 = vweird.f32 %v2057_v61 }
 0x787   :  { %vm371_vm8 = vmor %vm369_vm7, %vm370_vm5 }
 0x788   :  { %v366_v63 = vsub.f32 1.0, %v365_v62 }
 0x78a   :  { %v367_v0 = vmul.f32 %v2057_v61, %v366_v63 }
 0x78c   :  { %v368_v1 = vadd.f32 %v2057_v61, %v367_v0 }
 0x78e   :  { %v372_v8 = vsel %vm371_vm8, %v2057_v61, %v368_v1 }
 0x78f   :  { %v377_v11 = vsel %vm374_vm9, %v376_v9, %v372_v8 }
 0x790   :  { %v383_v18 = vmul.f32 %v381_v17, %v377_v11 }
 0x7ed   :  { %v386_v10 = vpop.permute.xlu0 %385 }
 0x7ee   :  { %v388_v12 = vmul.f32 %v386_v10, %v377_v11 }
 0x7f0   :  { %390 = vrot.lane.b32.xlu2 %v388_v12, %s2281_s4 }
 0x7f5   :  { %v708_v14 = vpop.permute.xlu0 %707 }
 0x7f6   :  { %v2484_v15 = vadd.f32 %v708_v14, %v700_v13 }
 0x7f8   :  { %2058 = vtanh.f32 %v2484_v15  ;;  %v768_v17 = vrot.slane %v2484_v15, 2 }
 0x7fe   :  { %v2059_v16 = vpop.eup %2058 }
 0x7ff   :  { %713 = vrot.lane.b32.xlu2 %v2059_v16, %s2280_s1 }
 0x84a   :  { %v391_v19 = vpop.permute.xlu2 %390 }
 0x84b   :  { %v2489_v20 = vadd.f32 %v391_v19, %v383_v18 }
 0x84d   :  { %2060 = vtanh.f32 %v2489_v20  ;;  %v448_v12 = vrot.slane %v2489_v20, 6 }
 0x853   :  { %v2061_v21 = vpop.eup %2060 }
 0x854   :  { %396 = vrot.lane.b32.xlu1 %v2061_v21, %s2280_s1 }
 0x859   :  { %v714_v22 = vpop.permute.xlu2 %713 }
 0x85a   :  { %v2493_v23 = vmul.f32 %v714_v22, %v697_v56 }
 0x85c   :  { %v718_v24 = vrot.slane %v2493_v23, 6 }
 0x85e   :  { %719 = vrot.lane.b32.xlu1 %v718_v24, %s2281_s4 }
 0x8c6   :  { %v397_v25 = vpop.permute.xlu1 %396 }
 0x8c7   :  { %v399_v26 = vmul.f32 %v397_v25, %v377_v11 }
 0x8c9   :  { %v401_v27 = vrot.slane %v399_v26, 6  ;;  %v2499_v32 = vsel %vm1203_vm10, %v2468_v31, %v399_v26 }
 0x8cb   :  { %402 = vrot.lane.b32.xlu0 %v401_v27, %s2281_s4 }
 0x8d0   :  { %v720_v34 = vpop.permute.xlu1 %719 }
 0x93d   :  { %v403_v31 = vpop.permute.xlu0 %402 }
 0x93e   :  { %1967 = vmatmul.msk.f32.vlgmr.msrb.gmra.mxu3 %vm193_vm6, %v403_v31 }
 0x93f   :  { %1011 = vmatpush.msrb.mxu3 %v2505_v2 }
 0x941   :  { %1012 = vmatpush.msrb.mxu3 %v2510_v28 }
 0x943   :  { %1013 = vmatpush.msrb.mxu3 %v2517_v29 }
 0x945   :  { %1014 = vmatpush.msrb.mxu3 %v2526_v30 }
 0x946   :  { %1976 = vmatmul.msk.f32.vlgmr.msra.gmra.mxu3 %vm193_vm6, %v720_v34 }
 0x9c1   :  { %v423_v39 = vpop.f32.mrf.mxu3 }
 0x9c2   :  { %v426_v33 = vadd.f32 %v423_v39, %v2546_v37 }
 0x9c4   :  { %2062 = vtanh.f32 %v426_v33  ;;  %v1968_v45 = vmul.f32 -1.442695, %v426_v33 }
 0x9c9   :  { %v740_v40 = vpop.f32.mrf.mxu3 }
 0x9ca   :  { %v2063_v41 = vpop.eup %2062  ;;  %v744_v42 = vrot.slane %v740_v40, 4 }
 0x9cb   :  { %452 = vrot.lane.b32.xlu2 %v2063_v41, %s2280_s1 }
 0x9cc   :  { %v746_v43 = vadd.f32 %v744_v42, %v2474_v38 }
 0x9ce   :  { %2064 = vtanh.f32 %v746_v43  ;;  %v1977_v49 = vmul.f32 -1.442695, %v746_v43 }
 0x9cf   :  { %2066 = vpow2.f32 %v1968_v45 }
 0x9d4   :  { %v2065_v44 = vpop.eup %2064 }
 0x9d5   :  { %772 = vrot.lane.b32.xlu0 %v2065_v44, %s2280_s1  ;;  %v2067_v4 = vpop.eup %2066 }
 0x9d6   :  { %v430_v5 = vadd.f32 1.0, %v2067_v4 }
 0x9d8   :  { %2068 = vrcp.f32 %v430_v5  ;;  %v442_v52 = vand.u32 2147483648, %v430_v5  ;;  %vm436_vm12 = vweird.f32 %v430_v5  ;;  %v440_v53 = vand.u32 2147483647, %v430_v5 }
 0x9d9   :  { %2070 = vpow2.f32 %v1977_v49 }
 0x9da   :  { %v443_v55 = vor.u32 1.1754944e-38, %v442_v52  ;;  %vm441_vm14 = vcmp.eq.f32.partialorder %v440_v53, 8.507059e+37 }
 0x9de   :  { %v2069_v46 = vpop.eup %2068 }
 0x9df   :  { %v432_v47 = vmul.f32 %v2069_v46, %v430_v5  ;;  %vm437_vm11 = vweird.f32 %v2069_v46  ;;  %v2071_v56 = vpop.eup %2070 }
 0x9e0   :  { %vm438_vm13 = vmor %vm436_vm12, %vm437_vm11  ;;  %v750_v7 = vadd.f32 1.0, %v2071_v56 }
 0x9e1   :  { %v433_v48 = vsub.f32 1.0, %v432_v47 }
 0x9e2   :  { %2072 = vrcp.f32 %v750_v7  ;;  %v762_v1 = vand.u32 2147483648, %v750_v7  ;;  %vm756_vm2 = vweird.f32 %v750_v7  ;;  %v760_v3 = vand.u32 2147483647, %v750_v7 }
 0x9e3   :  { %v434_v50 = vmul.f32 %v2069_v46, %v433_v48 }
 0x9e4   :  { %v763_v8 = vor.u32 1.1754944e-38, %v762_v1  ;;  %vm761_vm4 = vcmp.eq.f32.partialorder %v760_v3, 8.507059e+37 }
 0x9e5   :  { %v435_v51 = vadd.f32 %v2069_v46, %v434_v50 }
 0x9e7   :  { %v439_v54 = vsel %vm438_vm13, %v2069_v46, %v435_v51 }
 0x9e8   :  { %v444_v58 = vsel %vm441_vm14, %v443_v55, %v439_v54  ;;  %v2073_v60 = vpop.eup %2072 }
 0x9e9   :  { %v752_v61 = vmul.f32 %v2073_v60, %v750_v7  ;;  %vm757_vm1 = vweird.f32 %v2073_v60  ;;  %v450_v13 = vmul.f32 %v448_v12, %v444_v58 }
 0x9ea   :  { %vm758_vm3 = vmor %vm756_vm2, %vm757_vm1 }
 0x9eb   :  { %v753_v62 = vsub.f32 1.0, %v752_v61 }
 0x9ed   :  { %v754_v63 = vmul.f32 %v2073_v60, %v753_v62 }
 0x9ef   :  { %v755_v0 = vadd.f32 %v2073_v60, %v754_v63 }
 0x9f1   :  { %v759_v6 = vsel %vm758_vm3, %v2073_v60, %v755_v0 }
 0x9f2   :  { %v764_v10 = vsel %vm761_vm4, %v763_v8, %v759_v6 }
 0x9f3   :  { %v770_v19 = vmul.f32 %v768_v17, %v764_v10 }
 0xa25   :  { %v453_v57 = vpop.permute.xlu2 %452 }
 0xa26   :  { %v455_v59 = vmul.f32 %v453_v57, %v444_v58 }
 0xa28   :  { %457 = vrot.lane.b32.xlu1 %v455_v59, %s2281_s4 }
 0xa47   :  { %v773_v9 = vpop.permute.xlu0 %772 }
 0xa48   :  { %v775_v11 = vmul.f32 %v773_v9, %v764_v10 }
 0xa4a   :  { %777 = vrot.lane.b32.xlu2 %v775_v11, %s2281_s4 }
 0xa9a   :  { %v458_v14 = vpop.permute.xlu1 %457 }
 0xa9b   :  { %v2555_v16 = vadd.f32 %v458_v14, %v450_v13 }
 0xa9d   :  { %2074 = vtanh.f32 %v2555_v16  ;;  %v517_v12 = vrot.slane %v2555_v16, 6 }
 0xaa3   :  { %v2075_v18 = vpop.eup %2074 }
 0xaa4   :  { %v778_v21 = vpop.permute.xlu2 %777  ;;  %463 = vrot.lane.b32.xlu0 %v2075_v18, %s2280_s1 }
 0xaa5   :  { %v2560_v22 = vadd.f32 %v778_v21, %v770_v19 }
 0xaa7   :  { %2076 = vtanh.f32 %v2560_v22  ;;  %v838_v19 = vrot.slane %v2560_v22, 2 }
 0xaad   :  { %v2077_v24 = vpop.eup %2076 }
 0xaae   :  { %783 = vrot.lane.b32.xlu1 %v2077_v24, %s2280_s1 }
 0xb16   :  { %v464_v20 = vpop.permute.xlu0 %463 }
 0xb17   :  { %v2564_v25 = vmul.f32 %v464_v20, %v444_v58 }
 0xb19   :  { %468 = vrot.lane.b32.xlu2 %v2564_v25, %s2281_s4 }
 0xb20   :  { %v784_v26 = vpop.permute.xlu1 %783 }
 0xb21   :  { %v2568_v15 = vmul.f32 %v784_v26, %v764_v10 }
 0xb23   :  { %v788_v27 = vrot.slane %v2568_v15, 4 }
 0xb25   :  { %789 = vrot.lane.b32.xlu0 %v788_v27, %s2281_s4 }
 0xb73   :  { %v469_v31 = vpop.permute.xlu2 %468 }
 0xb74   :  { %1969 = vmatmul.msk.f32.vlgmr.msrb.gmra.mxu0 %vm193_vm6, %v469_v31 }
 0xb75   :  { %1081 = vmatpush.msrb.mxu0 %v2505_v2 }
 0xb77   :  { %1082 = vmatpush.msrb.mxu0 %v2510_v28 }
 0xb79   :  { %1083 = vmatpush.msrb.mxu0 %v2517_v29 }
 0xb7b   :  { %1084 = vmatpush.msrb.mxu0 %v2526_v30 }
 0xb97   :  { %v790_v34 = vpop.permute.xlu0 %789 }
 0xb98   :  { %1978 = vmatmul.msk.f32.vlgmr.msra.gmra.mxu0 %vm193_vm6, %v790_v34 }
 0xbf1   :  { %v489_v35 = vpop.f32.mrf.mxu0 }
 0xbf2   :  { %v493_v39 = vrot.slane %v489_v35, 6 }
 0xbf4   :  { %v495_v33 = vadd.f32 %v493_v39, %v2546_v37 }
 0xbf6   :  { %2078 = vtanh.f32 %v495_v33  ;;  %v1970_v45 = vmul.f32 -1.442695, %v495_v33 }
 0xbfc   :  { %v2079_v40 = vpop.eup %2078 }
 0xbfd   :  { %521 = vrot.lane.b32.xlu1 %v2079_v40, %s2280_s1 }
 0xc15   :  { %v810_v41 = vpop.f32.mrf.mxu0 }
 0xc16   :  { %v814_v42 = vrot.slane %v810_v41, 6 }
 0xc18   :  { %v816_v43 = vadd.f32 %v814_v42, %v2474_v38 }
 0xc1a   :  { %2080 = vtanh.f32 %v816_v43  ;;  %v1979_v5 = vmul.f32 -1.442695, %v816_v43 }
 0xc1b   :  { %2082 = vpow2.f32 %v1970_v45 }
 0xc1c   :  { %2084 = vpow2.f32 %v1979_v5 }
 0xc20   :  { %v2081_v44 = vpop.eup %2080 }
 0xc21   :  { %842 = vrot.lane.b32.xlu2 %v2081_v44, %s2280_s1  ;;  %v2083_v4 = vpop.eup %2082 }
 0xc22   :  { %v499_v46 = vadd.f32 1.0, %v2083_v4  ;;  %v2085_v47 = vpop.eup %2084 }
 0xc23   :  { %v820_v49 = vadd.f32 1.0, %v2085_v47 }
 0xc24   :  { %2086 = vrcp.f32 %v499_v46  ;;  %v511_v56 = vand.u32 2147483648, %v499_v46  ;;  %vm505_vm7 = vweird.f32 %v499_v46  ;;  %v509_v57 = vand.u32 2147483647, %v499_v46 }
 0xc25   :  { %2088 = vrcp.f32 %v820_v49  ;;  %v832_v1 = vand.u32 2147483648, %v820_v49  ;;  %vm826_vm12 = vweird.f32 %v820_v49  ;;  %v830_v3 = vand.u32 2147483647, %v820_v49 }
 0xc26   :  { %v512_v7 = vor.u32 1.1754944e-38, %v511_v56  ;;  %vm510_vm9 = vcmp.eq.f32.partialorder %v509_v57, 8.507059e+37 }
 0xc27   :  { %v833_v8 = vor.u32 1.1754944e-38, %v832_v1  ;;  %vm831_vm14 = vcmp.eq.f32.partialorder %v830_v3, 8.507059e+37 }
 0xc2a   :  { %v2087_v48 = vpop.eup %2086 }
 0xc2b   :  { %v501_v50 = vmul.f32 %v2087_v48, %v499_v46  ;;  %v2089_v53 = vpop.eup %2088  ;;  %vm506_vm5 = vweird.f32 %v2087_v48 }
 0xc2c   :  { %v822_v55 = vmul.f32 %v2089_v53, %v820_v49  ;;  %vm507_vm8 = vmor %vm505_vm7, %vm506_vm5  ;;  %vm827_vm11 = vweird.f32 %v2089_v53 }
 0xc2d   :  { %v502_v51 = vsub.f32 1.0, %v501_v50  ;;  %vm828_vm13 = vmor %vm826_vm12, %vm827_vm11 }
 0xc2e   :  { %v823_v59 = vsub.f32 1.0, %v822_v55 }
 0xc2f   :  { %v503_v52 = vmul.f32 %v2087_v48, %v502_v51 }
 0xc30   :  { %v824_v63 = vmul.f32 %v2089_v53, %v823_v59 }
 0xc31   :  { %v504_v54 = vadd.f32 %v2087_v48, %v503_v52 }
 0xc32   :  { %v825_v0 = vadd.f32 %v2089_v53, %v824_v63 }
 0xc33   :  { %v508_v58 = vsel %vm507_vm8, %v2087_v48, %v504_v54 }
 0xc34   :  { %v513_v60 = vsel %vm510_vm9, %v512_v7, %v508_v58  ;;  %v829_v6 = vsel %vm828_vm13, %v2089_v53, %v825_v0 }
 0xc35   :  { %v834_v10 = vsel %vm831_vm14, %v833_v8, %v829_v6  ;;  %v519_v13 = vmul.f32 %v517_v12, %v513_v60 }
 0xc36   :  { %v840_v21 = vmul.f32 %v838_v19, %v834_v10 }
 0xc6f   :  { %v522_v61 = vpop.permute.xlu1 %521 }
 0xc70   :  { %v524_v62 = vmul.f32 %v522_v61, %v513_v60 }
 0xc72   :  { %526 = vrot.lane.b32.xlu0 %v524_v62, %s2281_s4 }
 0xc7b   :  { %v843_v9 = vpop.permute.xlu2 %842 }
 0xc7c   :  { %v845_v11 = vmul.f32 %v843_v9, %v834_v10 }
 0xc7e   :  { %847 = vrot.lane.b32.xlu1 %v845_v11, %s2281_s4 }
 0xce4   :  { %v527_v14 = vpop.permute.xlu0 %526 }
 0xce5   :  { %v2585_v17 = vadd.f32 %v527_v14, %v519_v13 }
 0xce7   :  { %2090 = vtanh.f32 %v2585_v17  ;;  %v587_v9 = vrot.slane %v2585_v17, 6 }
 0xced   :  { %v2091_v18 = vpop.eup %2090 }
 0xcee   :  { %532 = vrot.lane.b32.xlu2 %v2091_v18, %s2280_s1 }
 0xcf0   :  { %v848_v24 = vpop.permute.xlu1 %847 }
 0xcf1   :  { %v2590_v20 = vadd.f32 %v848_v24, %v840_v21 }
 0xcf3   :  { %2092 = vtanh.f32 %v2590_v20  ;;  %v905_v14 = vrot.slane %v2590_v20, 2 }
 0xcf9   :  { %v2093_v26 = vpop.eup %2092 }
 0xcfa   :  { %853 = vrot.lane.b32.xlu0 %v2093_v26, %s2280_s1 }
 0xd48   :  { %v533_v16 = vpop.permute.xlu2 %532 }
 0xd49   :  { %v2594_v27 = vmul.f32 %v533_v16, %v513_v60 }
 0xd4b   :  { %v537_v31 = vrot.slane %v2594_v27, 2  ;;  %v1205_v16 = vsel %vm1200_vm15, %v2564_v25, %v2594_v27 }
 0xd4d   :  { %538 = vrot.lane.b32.xlu1 %v537_v31, %s2281_s4 }
 0xd6c   :  { %v854_v34 = vpop.permute.xlu0 %853 }
 0xd6d   :  { %v2598_v22 = vmul.f32 %v854_v34, %v834_v10 }
 0xd6f   :  { %v858_v35 = vrot.slane %v2598_v22, 2 }
 0xd71   :  { %859 = vrot.lane.b32.xlu2 %v858_v35, %s2281_s4 }
 0xdbf   :  { %v539_v39 = vpop.permute.xlu1 %538 }
 0xdc0   :  { %1971 = vmatmul.msk.f32.vlgmr.msrb.gmra.mxu1 %vm193_vm6, %v539_v39 }
 0xdc1   :  { %1151 = vmatpush.msrb.mxu1 %v2505_v2 }
 0xdc3   :  { %1152 = vmatpush.msrb.mxu1 %v2510_v28 }
 0xdc5   :  { %1153 = vmatpush.msrb.mxu1 %v2517_v29 }
 0xdc7   :  { %1154 = vmatpush.msrb.mxu1 %v2526_v30 }
 0xdcb   :  { %v860_v33 = vpop.permute.xlu2 %859 }
 0xdcc   :  { %1980 = vmatmul.msk.f32.vlgmr.msra.gmra.mxu1 %vm193_vm6, %v860_v33 }
 0xe3d   :  { %v559_v40 = vpop.f32.mrf.mxu1 }
 0xe3e   :  { %v563_v41 = vrot.slane %v559_v40, 4 }
 0xe40   :  { %v565_v42 = vadd.f32 %v563_v41, %v2546_v37 }
 0xe42   :  { %2094 = vtanh.f32 %v565_v42  ;;  %v1972_v29 = vmul.f32 -1.442695, %v565_v42 }
 0xe48   :  { %v2095_v43 = vpop.eup %2094 }
 0xe49   :  { %v880_v44 = vpop.f32.mrf.mxu1  ;;  %591 = vrot.lane.b32.xlu0 %v2095_v43, %s2280_s1 }
 0xe4a   :  { %v883_v2 = vadd.f32 %v880_v44, %v2474_v38 }
 0xe4c   :  { %2096 = vtanh.f32 %v883_v2  ;;  %v1981_v45 = vmul.f32 -1.442695, %v883_v2 }
 0xe4d   :  { %2098 = vpow2.f32 %v1972_v29 }
 0xe4e   :  { %2100 = vpow2.f32 %v1981_v45 }
 0xe52   :  { %v2097_v28 = vpop.eup %2096 }
 0xe53   :  { %909 = vrot.lane.b32.xlu1 %v2097_v28, %s2280_s1  ;;  %v2099_v30 = vpop.eup %2098 }
 0xe54   :  { %v569_v4 = vadd.f32 1.0, %v2099_v30  ;;  %v2101_v5 = vpop.eup %2100 }
 0xe55   :  { %v887_v47 = vadd.f32 1.0, %v2101_v5 }
 0xe56   :  { %2102 = vrcp.f32 %v569_v4  ;;  %v581_v53 = vand.u32 2147483648, %v569_v4  ;;  %vm575_vm2 = vweird.f32 %v569_v4  ;;  %v579_v54 = vand.u32 2147483647, %v569_v4 }
 0xe57   :  { %2104 = vrcp.f32 %v887_v47  ;;  %v899_v62 = vand.u32 2147483648, %v887_v47  ;;  %vm893_vm7 = vweird.f32 %v887_v47  ;;  %v897_v63 = vand.u32 2147483647, %v887_v47 }
 0xe58   :  { %v582_v57 = vor.u32 1.1754944e-38, %v581_v53  ;;  %vm580_vm4 = vcmp.eq.f32.partialorder %v579_v54, 8.507059e+37 }
 0xe59   :  { %v900_v1 = vor.u32 1.1754944e-38, %v899_v62  ;;  %vm898_vm9 = vcmp.eq.f32.partialorder %v897_v63, 8.507059e+37 }
 0xe5c   :  { %v2103_v46 = vpop.eup %2102 }
 0xe5d   :  { %v571_v48 = vmul.f32 %v2103_v46, %v569_v4  ;;  %v2105_v50 = vpop.eup %2104  ;;  %vm576_vm1 = vweird.f32 %v2103_v46 }
 0xe5e   :  { %v889_v38 = vmul.f32 %v2105_v50, %v887_v47  ;;  %vm577_vm3 = vmor %vm575_vm2, %vm576_vm1  ;;  %vm894_vm5 = vweird.f32 %v2105_v50 }
 0xe5f   :  { %v572_v49 = vsub.f32 1.0, %v571_v48  ;;  %vm895_vm8 = vmor %vm893_vm7, %vm894_vm5 }
 0xe60   :  { %v890_v55 = vsub.f32 1.0, %v889_v38 }
 0xe61   :  { %v573_v51 = vmul.f32 %v2103_v46, %v572_v49 }
 0xe62   :  { %v891_v58 = vmul.f32 %v2105_v50, %v890_v55 }
 0xe63   :  { %v574_v52 = vadd.f32 %v2103_v46, %v573_v51 }
 0xe64   :  { %v892_v61 = vadd.f32 %v2105_v50, %v891_v58 }
 0xe65   :  { %v578_v56 = vsel %vm577_vm3, %v2103_v46, %v574_v52 }
 0xe66   :  { %v583_v7 = vsel %vm580_vm4, %v582_v57, %v578_v56  ;;  %v896_v0 = vsel %vm895_vm8, %v2105_v50, %v892_v61 }
 0xe67   :  { %v901_v6 = vsel %vm898_vm9, %v900_v1, %v896_v0  ;;  %v589_v10 = vmul.f32 %v587_v9, %v583_v7 }
 0xe68   :  { %v907_v18 = vmul.f32 %v905_v14, %v901_v6 }
 0xebb   :  { %v592_v59 = vpop.permute.xlu0 %591 }
 0xebc   :  { %v594_v60 = vmul.f32 %v592_v59, %v583_v7 }
 0xebe   :  { %596 = vrot.lane.b32.xlu2 %v594_v60, %s2281_s4 }
 0xec5   :  { %v910_v3 = vpop.permute.xlu1 %909 }
 0xec6   :  { %v912_v8 = vmul.f32 %v910_v3, %v901_v6 }
 0xec8   :  { %914 = vrot.lane.b32.xlu0 %v912_v8, %s2281_s4 }
 0xf18   :  { %v597_v11 = vpop.permute.xlu2 %596 }
 0xf19   :  { %v2615_v12 = vadd.f32 %v597_v11, %v589_v10 }
 0xf1b   :  { %2106 = vtanh.f32 %v2615_v12 }
 0xf21   :  { %v2107_v13 = vpop.eup %2106 }
 0xf22   :  { %602 = vrot.lane.b32.xlu1 %v2107_v13, %s2280_s1 }
 0xf3a   :  { %v915_v19 = vpop.permute.xlu0 %914 }
 0xf3b   :  { %v917_v21 = vadd.f32 %v915_v19, %v907_v18 }
 0xf3d   :  { %2108 = vtanh.f32 %v917_v21  ;;  %v974_v38 = vrot.slane %v917_v21, 2 }
 0xf43   :  { %v2109_v24 = vpop.eup %2108 }
 0xf44   :  { %920 = vrot.lane.b32.xlu2 %v2109_v24, %s2280_s1 }
 0xf94   :  { %v603_v26 = vpop.permute.xlu1 %602 }
 0xf95   :  { %v605_v17 = vmul.f32 %v603_v26, %v583_v7 }
 0xf97   :  { %v607_v31 = vrot.slane %v605_v17, 4  ;;  %v2625_v34 = vsel %vm98_vm0, %v1205_v16, %v605_v17 }
 0xf99   :  { %608 = vrot.lane.b32.xlu0 %v607_v31, %s2281_s4 }
 0xf9e   :  { %v921_v20 = vpop.permute.xlu2 %920 }
 0xf9f   :  { %v2628_v35 = vmul.f32 %v921_v20, %v901_v6 }
 0xfa1   :  { %925 = vrot.lane.b32.xlu1 %v2628_v35, %s2281_s4 }
0x100b   :  { %v609_v39 = vpop.permute.xlu0 %608 }
0x100c   :  { %1973 = vmatmul.msk.f32.vlgmr.msra.gmra.mxu2 %vm193_vm6, %v609_v39 }
0x1013   :  { %v926_v33 = vpop.permute.xlu1 %925 }
0x1014   :  { %1982 = vmatmul.msk.f32.vlgmr.msrb.gmra.mxu2 %vm193_vm6, %v926_v33 }
0x108f   :  { %v2634_v40 = vpop.f32.mrf.mxu2 }
0x1097   :  { %v946_v25 = vpop.f32.mrf.mxu2 }
0x1098   :  { %v950_v27 = vrot.slane %v946_v25, 2 }
0x109a   :  { %v952_v41 = vadd.f32 %v950_v27, %v2472_v36 }
0x109c   :  { %2110 = vtanh.f32 %v952_v41  ;;  %v1983_v43 = vmul.f32 -1.442695, %v952_v41 }
0x109e   :  { %2112 = vpow2.f32 %v1983_v43 }
0x10a2   :  { %v2111_v42 = vpop.eup %2110 }
0x10a3   :  { %978 = vrot.lane.b32.xlu2 %v2111_v42, %s2280_s1 }
0x10a4   :  { %v2113_v44 = vpop.eup %2112 }
0x10a5   :  { %v956_v2 = vadd.f32 1.0, %v2113_v44 }
0x10a7   :  { %2114 = vrcp.f32 %v956_v2  ;;  %v968_v5 = vand.u32 2147483648, %v956_v2  ;;  %vm962_vm12 = vweird.f32 %v956_v2  ;;  %v966_v46 = vand.u32 2147483647, %v956_v2 }
0x10a9   :  { %v969_v48 = vor.u32 1.1754944e-38, %v968_v5  ;;  %vm967_vm14 = vcmp.eq.f32.partialorder %v966_v46, 8.507059e+37 }
0x10ad   :  { %v2115_v28 = vpop.eup %2114 }
0x10ae   :  { %v958_v29 = vmul.f32 %v2115_v28, %v956_v2  ;;  %vm963_vm11 = vweird.f32 %v2115_v28 }
0x10af   :  { %vm964_vm13 = vmor %vm962_vm12, %vm963_vm11 }
0x10b0   :  { %v959_v30 = vsub.f32 1.0, %v958_v29 }
0x10b2   :  { %v960_v45 = vmul.f32 %v2115_v28, %v959_v30 }
0x10b4   :  { %v961_v4 = vadd.f32 %v2115_v28, %v960_v45 }
0x10b6   :  { %v965_v47 = vsel %vm964_vm13, %v2115_v28, %v961_v4 }
0x10b7   :  { %v970_v50 = vsel %vm967_vm14, %v969_v48, %v965_v47 }
0x10b8   :  { %v976_v52 = vmul.f32 %v974_v38, %v970_v50 }
0x10fd   :  { %v979_v49 = vpop.permute.xlu2 %978 }
0x10fe   :  { %v981_v51 = vmul.f32 %v979_v49, %v970_v50 }
0x1100   :  { %983 = vrot.lane.b32.xlu0 %v981_v51, %s2281_s4 }
0x1172   :  { %v984_v53 = vpop.permute.xlu0 %983 }
0x1173   :  { %v986_v54 = vadd.f32 %v984_v53, %v976_v52 }
0x1175   :  { %2116 = vtanh.f32 %v986_v54  ;;  %v1044_v26 = vrot.slane %v986_v54, 2 }
0x117b   :  { %v2117_v55 = vpop.eup %2116 }
0x117c   :  { %989 = vrot.lane.b32.xlu1 %v2117_v55, %s2280_s1 }
0x11ee   :  { %v990_v56 = vpop.permute.xlu1 %989 }
0x11ef   :  { %v2640_v57 = vmul.f32 %v990_v56, %v970_v50 }
0x11f1   :  { %v994_v58 = vrot.slane %v2640_v57, 6 }
0x11f3   :  { %995 = vrot.lane.b32.xlu2 %v994_v58, %s2281_s4 }
0x124d   :  { %v996_v59 = vpop.permute.xlu2 %995 }
0x124e   :  { %1984 = vmatmul.msk.f32.vlgmr.msrb.gmra.mxu3 %vm193_vm6, %v996_v59 }
0x12d1   :  { %v1016_v7 = vpop.f32.mrf.mxu3 }
0x12d2   :  { %v1020_v60 = vrot.slane %v1016_v7, 4 }
0x12d4   :  { %v1022_v61 = vadd.f32 %v1020_v60, %v2472_v36 }
0x12d6   :  { %2118 = vtanh.f32 %v1022_v61  ;;  %v1985_v63 = vmul.f32 -1.442695, %v1022_v61 }
0x12d8   :  { %2120 = vpow2.f32 %v1985_v63 }
0x12dc   :  { %v2119_v62 = vpop.eup %2118 }
0x12dd   :  { %1048 = vrot.lane.b32.xlu0 %v2119_v62, %s2280_s1 }
0x12de   :  { %v2121_v0 = vpop.eup %2120 }
0x12df   :  { %v1026_v1 = vadd.f32 1.0, %v2121_v0 }
0x12e1   :  { %2122 = vrcp.f32 %v1026_v1  ;;  %v1038_v11 = vand.u32 2147483648, %v1026_v1  ;;  %vm1032_vm2 = vweird.f32 %v1026_v1  ;;  %v1036_v13 = vand.u32 2147483647, %v1026_v1 }
0x12e3   :  { %v1039_v18 = vor.u32 1.1754944e-38, %v1038_v11  ;;  %vm1037_vm4 = vcmp.eq.f32.partialorder %v1036_v13, 8.507059e+37 }
0x12e7   :  { %v2123_v3 = vpop.eup %2122 }
0x12e8   :  { %v1028_v6 = vmul.f32 %v2123_v3, %v1026_v1  ;;  %vm1033_vm1 = vweird.f32 %v2123_v3 }
0x12e9   :  { %vm1034_vm3 = vmor %vm1032_vm2, %vm1033_vm1  ;;  %vm1254_vm1 = vcmask 523264  }
0x12ea   :  { %v1029_v8 = vsub.f32 1.0, %v1028_v6 }
0x12ec   :  { %v1030_v9 = vmul.f32 %v2123_v3, %v1029_v8 }
0x12ee   :  { %v1031_v10 = vadd.f32 %v2123_v3, %v1030_v9 }
0x12f0   :  { %v1035_v14 = vsel %vm1034_vm3, %v2123_v3, %v1031_v10 }
0x12f1   :  { %v1040_v21 = vsel %vm1037_vm4, %v1039_v18, %v1035_v14 }
0x12f2   :  { %v1046_v17 = vmul.f32 %v1044_v26, %v1040_v21 }
0x134f   :  { %v1049_v19 = vpop.permute.xlu0 %1048 }
0x1350   :  { %v1051_v24 = vmul.f32 %v1049_v19, %v1040_v21 }
0x1352   :  { %1053 = vrot.lane.b32.xlu1 %v1051_v24, %s2281_s4 }
0x13c4   :  { %v1054_v16 = vpop.permute.xlu1 %1053 }
0x13c5   :  { %v1056_v31 = vadd.f32 %v1054_v16, %v1046_v17 }
0x13c7   :  { %2124 = vtanh.f32 %v1056_v31  ;;  %v1114_v53 = vrot.slane %v1056_v31, 2 }
0x13cd   :  { %v2125_v20 = vpop.eup %2124 }
0x13ce   :  { %1059 = vrot.lane.b32.xlu2 %v2125_v20, %s2280_s1 }
0x1428   :  { %v1060_v39 = vpop.permute.xlu2 %1059 }
0x1429   :  { %v2649_v33 = vmul.f32 %v1060_v39, %v1040_v21  ;;  %v1246_v39 = vld [vmem:[#allocation3 + $0x70] sm:$0xff] }
0x142a   :  { %1269 = vmatpush.msra.mxu2 %v1246_v39 }
0x142b   :  { %v1064_v25 = vrot.slane %v2649_v33, 4 }
0x142d   :  { %1065 = vrot.lane.b32.xlu0 %v1064_v25, %s2281_s4  ;;  %v1247_v25 = vld [vmem:[#allocation3 + $0x78] sm:$0xff] }
0x142e   :  { %1292 = vmatpush.msra.mxu3 %v1247_v25 }
0x149f   :  { %v1066_v27 = vpop.permute.xlu0 %1065 }
0x14a0   :  { %1986 = vmatmul.msk.f32.vlgmr.msrb.gmra.mxu0 %vm193_vm6, %v1066_v27  ;;  %v1244_v27 = vld [vmem:[#allocation3 + $0x60] sm:$0xff] }
0x14a1   :  { %1270 = vmatpush.msra.mxu2 %v1244_v27 }
0x151d   :  { %v1086_v41 = vpop.f32.mrf.mxu0 }
0x151e   :  { %v1090_v42 = vrot.slane %v1086_v41, 6  ;;  %v1245_v41 = vld [vmem:[#allocation3 + $0x68] sm:$0xff] }
0x151f   :  { %1293 = vmatpush.msra.mxu3 %v1245_v41 }
0x1520   :  { %v1092_v43 = vadd.f32 %v1090_v42, %v2472_v36  ;;  %v1242_v42 = vld [vmem:[#allocation3 + $0x50] sm:$0xff] }
0x1521   :  { %1271 = vmatpush.msra.mxu2 %v1242_v42 }
0x1522   :  { %2126 = vtanh.f32 %v1092_v43  ;;  %v1987_v2 = vmul.f32 -1.442695, %v1092_v43  ;;  %v1243_v43 = vld [vmem:[#allocation3 + $0x58] sm:$0xff] }
0x1523   :  { %1294 = vmatpush.msra.mxu3 %v1243_v43 }
0x1524   :  { %2128 = vpow2.f32 %v1987_v2  ;;  %v1241_v2 = vld [vmem:[#allocation3 + $0x48] sm:$0xff] }
0x1525   :  { %1295 = vmatpush.msra.mxu3 %v1241_v2 }
0x1528   :  { %v2127_v44 = vpop.eup %2126 }
0x1529   :  { %1118 = vrot.lane.b32.xlu1 %v2127_v44, %s2280_s1  ;;  %v1240_v44 = vld [vmem:[#allocation3 + $0x40] sm:$0xff] }
0x152a   :  { %v2129_v28 = vpop.eup %2128  ;;  %1272 = vmatpush.msra.mxu2 %v1240_v44 }
0x152b   :  { %v1096_v29 = vadd.f32 1.0, %v2129_v28  ;;  %v1238_v28 = vld [vmem:[#allocation3 + $0x30] sm:$0xff] }
0x152c   :  { %1273 = vmatpush.msra.mxu2 %v1238_v28 }
0x152d   :  { %2130 = vrcp.f32 %v1096_v29  ;;  %v1108_v47 = vand.u32 2147483648, %v1096_v29  ;;  %vm1102_vm7 = vweird.f32 %v1096_v29  ;;  %v1106_v48 = vand.u32 2147483647, %v1096_v29 }
0x152f   :  { %v1109_v50 = vor.u32 1.1754944e-38, %v1108_v47  ;;  %vm1107_vm9 = vcmp.eq.f32.partialorder %v1106_v48, 8.507059e+37 }
0x1533   :  { %v2131_v30 = vpop.eup %2130 }
0x1534   :  { %v1098_v45 = vmul.f32 %v2131_v30, %v1096_v29  ;;  %vm1103_vm5 = vweird.f32 %v2131_v30  ;;  %v1239_v29 = vld [vmem:[#allocation3 + $0x38] sm:$0xff] }
0x1535   :  { %vm1104_vm8 = vmor %vm1102_vm7, %vm1103_vm5  ;;  %1296 = vmatpush.msra.mxu3 %v1239_v29 }
0x1536   :  { %v1099_v4 = vsub.f32 1.0, %v1098_v45  ;;  %v1237_v45 = vld [vmem:[#allocation3 + $0x28] sm:$0xff] }
0x1537   :  { %1297 = vmatpush.msra.mxu3 %v1237_v45 }
0x1538   :  { %v1100_v5 = vmul.f32 %v2131_v30, %v1099_v4  ;;  %v1234_v4 = vld [vmem:[#allocation3 + $0x10] sm:$0xff] }
0x153a   :  { %v1101_v46 = vadd.f32 %v2131_v30, %v1100_v5  ;;  %v1235_v5 = vld [vmem:[#allocation3 + $0x18] sm:$0xff] }
0x153b   :  { %1298 = vmatpush.msra.mxu3 %v1235_v5 }
0x153c   :  { %v1105_v49 = vsel %vm1104_vm8, %v2131_v30, %v1101_v46  ;;  %v1236_v30 = vld [vmem:[#allocation3 + $0x20] sm:$0xff] }
0x153d   :  { %v1110_v38 = vsel %vm1107_vm9, %v1109_v50, %v1105_v49  ;;  %1274 = vmatpush.msra.mxu2 %v1236_v30 }
0x153e   :  { %v1116_v54 = vmul.f32 %v1114_v53, %v1110_v38 }
0x153f   :  { %1275 = vmatpush.msra.mxu2 %v1234_v4 }
0x159b   :  { %v1119_v51 = vpop.permute.xlu1 %1118 }
0x159c   :  { %v1121_v52 = vmul.f32 %v1119_v51, %v1110_v38  ;;  %v1232_v51 = vld [vmem:[#allocation3] sm:$0xff] }
0x159d   :  { %1276 = vmatpush.msra.mxu2 %v1232_v51 }
0x159e   :  { %1123 = vrot.lane.b32.xlu2 %v1121_v52, %s2281_s4 }
0x15f8   :  { %v1124_v55 = vpop.permute.xlu2 %1123 }
0x15f9   :  { %v1126_v56 = vadd.f32 %v1124_v55, %v1116_v54 }
0x15fb   :  { %2132 = vtanh.f32 %v1126_v56  ;;  %v1181_v26 = vrot.slane %v1126_v56, 2 }
0x1601   :  { %v2133_v58 = vpop.eup %2132 }
0x1602   :  { %1129 = vrot.lane.b32.xlu0 %v2133_v58, %s2280_s1 }
0x1674   :  { %v1130_v59 = vpop.permute.xlu0 %1129 }
0x1675   :  { %v2658_v7 = vmul.f32 %v1130_v59, %v1110_v38  ;;  %v1233_v38 = vld [vmem:[#allocation3 + $0x8] sm:$0xff] }
0x1676   :  { %1299 = vmatpush.msra.mxu3 %v1233_v38 }
0x1677   :  { %v1134_v60 = vrot.slane %v2658_v7, 2 }
0x1679   :  { %1135 = vrot.lane.b32.xlu1 %v1134_v60, %s2281_s4 }
0x16eb   :  { %v1136_v61 = vpop.permute.xlu1 %1135 }
0x16ec   :  { %1988 = vmatmul.msk.f32.vlgmr.msrb.gmra.mxu1 %vm193_vm6, %v1136_v61 }
0x1769   :  { %v1156_v62 = vpop.f32.mrf.mxu1 }
0x176a   :  { %v1159_v63 = vadd.f32 %v1156_v62, %v2472_v36 }
0x176c   :  { %2134 = vtanh.f32 %v1159_v63  ;;  %v1989_v1 = vmul.f32 -1.442695, %v1159_v63 }
0x176e   :  { %2136 = vpow2.f32 %v1989_v1 }
0x1772   :  { %v2135_v0 = vpop.eup %2134 }
0x1773   :  { %1185 = vrot.lane.b32.xlu2 %v2135_v0, %s2280_s1 }
0x1774   :  { %v2137_v3 = vpop.eup %2136 }
0x1775   :  { %v1163_v6 = vadd.f32 1.0, %v2137_v3 }
0x1777   :  { %2138 = vrcp.f32 %v1163_v6  ;;  %v1175_v14 = vand.u32 2147483648, %v1163_v6  ;;  %vm1169_vm12 = vweird.f32 %v1163_v6  ;;  %v1173_v36 = vand.u32 2147483647, %v1163_v6 }
0x1779   :  { %v1176_v19 = vor.u32 1.1754944e-38, %v1175_v14  ;;  %vm1174_vm14 = vcmp.eq.f32.partialorder %v1173_v36, 8.507059e+37 }
0x177b   :  { %1216 = vrot.lane.b32.xlu2 %v2499_v32, %s2281_s4 }
0x177d   :  { %v2139_v8 = vpop.eup %2138 }
0x177e   :  { %v1165_v9 = vmul.f32 %v2139_v8, %v1163_v6  ;;  %vm1170_vm11 = vweird.f32 %v2139_v8 }
0x177f   :  { %vm1171_vm13 = vmor %vm1169_vm12, %vm1170_vm11 }
0x1780   :  { %v1166_v10 = vsub.f32 1.0, %v1165_v9 }
0x1782   :  { %v1167_v11 = vmul.f32 %v2139_v8, %v1166_v10 }
0x1784   :  { %v1168_v13 = vadd.f32 %v2139_v8, %v1167_v11 }
0x1786   :  { %v1172_v18 = vsel %vm1171_vm13, %v2139_v8, %v1168_v13 }
0x1787   :  { %v1177_v32 = vsel %vm1174_vm14, %v1176_v19, %v1172_v18 }
0x1788   :  { %v1183_v17 = vmul.f32 %v1181_v26, %v1177_v32  ;;  %v2712_v26 = vld [vmem:[%s2877_s6 + $0x8] sm:$0xff] }
0x17cd   :  { %v1186_v21 = vpop.permute.xlu2 %1185 }
0x17ce   :  { %v1188_v24 = vmul.f32 %v1186_v21, %v1177_v32 }
0x17d0   :  { %1190 = vrot.lane.b32.xlu0 %v1188_v24, %s2281_s4  ;;  %v2705_v24 = vld [vmem:[%s2877_s6 + $0x10] sm:$0xff] }
0x17d5   :  { %v1217_v52 = vpop.permute.xlu2 %1216 }
0x1842   :  { %v1191_v16 = vpop.permute.xlu0 %1190 }
0x1843   :  { %v1193_v31 = vadd.f32 %v1191_v16, %v1183_v17  ;;  %v2720_v17 = vld [vmem:[%s2877_s6] sm:$0xff] }
0x1845   :  { %2140 = vtanh.f32 %v1193_v31 }
0x184b   :  { %v2141_v20 = vpop.eup %2140 }
0x184c   :  { %1196 = vrot.lane.b32.xlu1 %v2141_v20, %s2280_s1 }
0x18be   :  { %v1197_v46 = vpop.permute.xlu1 %1196 }
0x18bf   :  { %v1199_v47 = vmul.f32 %v1197_v46, %v1177_v32  ;;  %v2700_v32 = vld [vmem:[%s2877_s6 + $0x18] sm:$0xff] }
0x18c0   :  { %1364 = vmatpush.msra.mxu0 %v2700_v32  ;;  %1434 = vmatpush.msra.mxu1 %v2700_v32 }
0x18c1   :  { %v1208_v48 = vsel %vm1200_vm15, %v1199_v47, %v2658_v7  ;;  %1780 = vmatpush.msrb.mxu2 %v2700_v32 }
0x18c2   :  { %v1209_v49 = vsel %vm98_vm0, %v1208_v48, %v2649_v33  ;;  %v2682_v33 = vld [vmem:[%s2879_s8] sm:$0x3]  ;;  %1365 = vmatpush.msra.mxu0 %v2705_v24  ;;  %1435 = vmatpush.msra.mxu1 %v2705_v24 }
0x18c3   :  { %v1210_v50 = vsel %vm1203_vm10, %v1209_v49, %v2640_v57  ;;  %v1250_v57 = vperm.slane %v2682_v33, 0  ;;  %1781 = vmatpush.msrb.mxu2 %v2705_v24 }
0x18c4   :  { %1224 = vrot.lane.b32.xlu0 %v1210_v50, %s2280_s1  ;;  %1366 = vmatpush.msra.mxu0 %v2712_v26 }
0x18c5   :  { %1436 = vmatpush.msra.mxu1 %v2712_v26  ;;  %1782 = vmatpush.msrb.mxu2 %v2712_v26 }
0x18c6   :  { %1367 = vmatpush.msra.mxu0 %v2720_v17 }
0x18c7   :  { %1437 = vmatpush.msra.mxu1 %v2720_v17  ;;  %1783 = vmatpush.msrb.mxu2 %v2720_v17 }
0x18c8   :  { %1504 = vmatpush.msrb.mxu0 %v2700_v32 }
0x18c9   :  { %1574 = vmatpush.msrb.mxu1 %v2700_v32 }
0x18ca   :  { %1505 = vmatpush.msrb.mxu0 %v2705_v24 }
0x18cb   :  { %1575 = vmatpush.msrb.mxu1 %v2705_v24 }
0x18cc   :  { %1506 = vmatpush.msrb.mxu0 %v2712_v26 }
0x18cd   :  { %1576 = vmatpush.msrb.mxu1 %v2712_v26 }
0x18ce   :  { %1507 = vmatpush.msrb.mxu0 %v2720_v17 }
0x18cf   :  { %1577 = vmatpush.msrb.mxu1 %v2720_v17 }
0x1936   :  { %v1225_v53 = vpop.permute.xlu0 %1224 }
0x1937   :  { %v1230_v54 = vsel %vm193_vm6, %v1217_v52, %v1225_v53 }
0x1938   :  { %1990 = vmatmul.msk.f32.vlgmr.msra.gmra.mxu2 %vm1254_vm1, %v1230_v54  ;;  %1992 = vmatmul.msk.f32.vlgmr.msra.gmra.mxu3 %vm1254_vm1, %v1230_v54 }
0x19bb   :  { %v1278_v55 = vpop.f32.mrf.mxu2  ;;  %v1301_v56 = vpop.f32.mrf.mxu3 }
0x19bc   :  { %v2687_v58 = vadd.f32 %v1278_v55, %v1250_v57 }
0x19be   :  { %2142 = vtanh.f32 %v2687_v58  ;;  %v1994_v7 = vmul.f32 -1.442695, %v2687_v58 }
0x19c0   :  { %2144 = vpow2.f32 %v1994_v7 }
0x19c4   :  { %v2143_v59 = vpop.eup %2142 }
0x19c5   :  { %1332 = vrot.lane.b32.xlu1 %v2143_v59, %s2280_s1 }
0x19c6   :  { %v2145_v60 = vpop.eup %2144 }
0x19c7   :  { %v1313_v61 = vadd.f32 1.0, %v2145_v60 }
0x19c9   :  { %2146 = vrcp.f32 %v1313_v61  ;;  %v1325_v6 = vand.u32 2147483648, %v1313_v61  ;;  %vm1319_vm3 = vweird.f32 %v1313_v61  ;;  %v1323_v8 = vand.u32 2147483647, %v1313_v61 }
0x19cb   :  { %v1326_v10 = vor.u32 1.1754944e-38, %v1325_v6  ;;  %vm1324_vm5 = vcmp.eq.f32.partialorder %v1323_v8, 8.507059e+37 }
0x19cf   :  { %v2147_v62 = vpop.eup %2146 }
0x19d0   :  { %v1315_v63 = vmul.f32 %v2147_v62, %v1313_v61  ;;  %vm1320_vm2 = vweird.f32 %v2147_v62 }
0x19d1   :  { %vm1321_vm4 = vmor %vm1319_vm3, %vm1320_vm2 }
0x19d2   :  { %v1316_v0 = vsub.f32 1.0, %v1315_v63 }
0x19d4   :  { %v1317_v1 = vmul.f32 %v2147_v62, %v1316_v0 }
0x19d6   :  { %v1318_v3 = vadd.f32 %v2147_v62, %v1317_v1 }
0x19d8   :  { %v1322_v9 = vsel %vm1321_vm4, %v2147_v62, %v1318_v3 }
0x19d9   :  { %v1327_v13 = vsel %vm1324_vm5, %v1326_v10, %v1322_v9 }
0x19da   :  { %v1330_v36 = vmul.f32 0.0, %v1327_v13 }
0x1a37   :  { %v1333_v11 = vpop.permute.xlu1 %1332 }
0x1a38   :  { %v1335_v14 = vmul.f32 %v1333_v11, %v1327_v13 }
0x1a3a   :  { %1337 = vrot.lane.b32.xlu2 %v1335_v14, %s2281_s4 }
0x1a94   :  { %v1338_v18 = vpop.permute.xlu2 %1337 }
0x1a95   :  { %v2693_v19 = vadd.f32 %v1338_v18, %v1330_v36  ;;  %v633_v36 = vrot.slane %v2634_v40, 2 }
0x1a97   :  { %2148 = vtanh.f32 %v2693_v19  ;;  %v1397_v51 = vrot.slane %v2693_v19, 6 }
0x1a9d   :  { %v2149_v21 = vpop.eup %2148 }
0x1a9e   :  { %1343 = vrot.lane.b32.xlu0 %v2149_v21, %s2280_s1  ;;  %v635_v21 = vadd.f32 %v633_v36, %v2546_v37 }
0x1aa0   :  { %v1974_v37 = vmul.f32 -1.442695, %v635_v21 }
0x1b10   :  { %v1344_v16 = vpop.permute.xlu0 %1343 }
0x1b11   :  { %v1346_v31 = vmul.f32 %v1344_v16, %v1327_v13 }
0x1b13   :  { %1348 = vrot.lane.b32.xlu1 %v1346_v31, %s2281_s4 }
0x1b85   :  { %v1349_v20 = vpop.permute.xlu1 %1348 }
0x1b86   :  { %1995 = vmatmul.msk.f32.vlgmr.msra.gmra.mxu0 %vm193_vm6, %v1349_v20 }
0x1b87   :  { %1640 = vmatpush.msra.mxu0 %v2700_v32 }
0x1b89   :  { %1641 = vmatpush.msra.mxu0 %v2705_v24 }
0x1b8b   :  { %1642 = vmatpush.msra.mxu0 %v2712_v26 }
0x1b8d   :  { %1643 = vmatpush.msra.mxu0 %v2720_v17 }
0x1c03   :  { %v1369_v39 = vpop.f32.mrf.mxu0 }
0x1c04   :  { %v1373_v25 = vrot.slane %v1369_v39, 6 }
0x1c06   :  { %v1375_v27 = vadd.f32 %v1373_v25, %v2687_v58 }
0x1c08   :  { %2150 = vtanh.f32 %v1375_v27  ;;  %v1996_v42 = vmul.f32 -1.442695, %v1375_v27 }
0x1c0a   :  { %2152 = vpow2.f32 %v1996_v42 }
0x1c0e   :  { %v2151_v41 = vpop.eup %2150 }
0x1c0f   :  { %1401 = vrot.lane.b32.xlu2 %v2151_v41, %s2280_s1 }
0x1c10   :  { %v2153_v43 = vpop.eup %2152 }
0x1c11   :  { %v1379_v44 = vadd.f32 1.0, %v2153_v43 }
0x1c13   :  { %2154 = vrcp.f32 %v1379_v44  ;;  %v1391_v4 = vand.u32 2147483648, %v1379_v44  ;;  %vm1385_vm8 = vweird.f32 %v1379_v44  ;;  %v1389_v5 = vand.u32 2147483647, %v1379_v44 }
0x1c15   :  { %v1392_v47 = vor.u32 1.1754944e-38, %v1391_v4  ;;  %vm1390_vm11 = vcmp.eq.f32.partialorder %v1389_v5, 8.507059e+37 }
0x1c19   :  { %v2155_v2 = vpop.eup %2154 }
0x1c1a   :  { %v1381_v28 = vmul.f32 %v2155_v2, %v1379_v44  ;;  %vm1386_vm7 = vweird.f32 %v2155_v2 }
0x1c1b   :  { %vm1387_vm9 = vmor %vm1385_vm8, %vm1386_vm7 }
0x1c1c   :  { %v1382_v29 = vsub.f32 1.0, %v1381_v28 }
0x1c1e   :  { %v1383_v30 = vmul.f32 %v2155_v2, %v1382_v29 }
0x1c20   :  { %v1384_v45 = vadd.f32 %v2155_v2, %v1383_v30 }
0x1c22   :  { %v1388_v46 = vsel %vm1387_vm9, %v2155_v2, %v1384_v45 }
0x1c23   :  { %v1393_v49 = vsel %vm1390_vm11, %v1392_v47, %v1388_v46 }
0x1c24   :  { %v1399_v38 = vmul.f32 %v1397_v51, %v1393_v49 }
0x1c69   :  { %v1402_v48 = vpop.permute.xlu2 %1401 }
0x1c6a   :  { %v1404_v50 = vmul.f32 %v1402_v48, %v1393_v49 }
0x1c6c   :  { %1406 = vrot.lane.b32.xlu0 %v1404_v50, %s2281_s4 }
0x1cde   :  { %v1407_v52 = vpop.permute.xlu0 %1406 }
0x1cdf   :  { %v1409_v53 = vadd.f32 %v1407_v52, %v1399_v38 }
0x1ce1   :  { %2156 = vtanh.f32 %v1409_v53  ;;  %v1467_v16 = vrot.slane %v1409_v53, 6  ;;  %v657_v53 = vrot.slane %v2615_v12, 6 }
0x1ce7   :  { %v2157_v54 = vpop.eup %2156 }
0x1ce8   :  { %1412 = vrot.lane.b32.xlu1 %v2157_v54, %s2280_s1 }
0x1d5a   :  { %v1413_v55 = vpop.permute.xlu1 %1412 }
0x1d5b   :  { %v1415_v56 = vmul.f32 %v1413_v55, %v1393_v49 }
0x1d5d   :  { %v1417_v59 = vrot.slane %v1415_v56, 2 }
0x1d5f   :  { %1418 = vrot.lane.b32.xlu2 %v1417_v59, %s2281_s4 }
0x1db9   :  { %v1419_v7 = vpop.permute.xlu2 %1418 }
0x1dba   :  { %1997 = vmatmul.msk.f32.vlgmr.msra.gmra.mxu1 %vm193_vm6, %v1419_v7 }
0x1dbb   :  { %1710 = vmatpush.msra.mxu1 %v2700_v32 }
0x1dbd   :  { %1711 = vmatpush.msra.mxu1 %v2705_v24 }
0x1dbf   :  { %1712 = vmatpush.msra.mxu1 %v2712_v26 }
0x1dc1   :  { %1713 = vmatpush.msra.mxu1 %v2720_v17 }
0x1e37   :  { %v1439_v60 = vpop.f32.mrf.mxu1 }
0x1e38   :  { %v1443_v61 = vrot.slane %v1439_v60, 4  ;;  %v1211_v60 = vsel %vm1200_vm15, %v2628_v35, %v2598_v22 }
0x1e3a   :  { %v1445_v62 = vadd.f32 %v1443_v61, %v2687_v58 }
0x1e3c   :  { %2158 = vtanh.f32 %v1445_v62  ;;  %v1998_v0 = vmul.f32 -1.442695, %v1445_v62 }
0x1e3e   :  { %2160 = vpow2.f32 %v1998_v0 }
0x1e42   :  { %v2159_v63 = vpop.eup %2158 }
0x1e43   :  { %1471 = vrot.lane.b32.xlu0 %v2159_v63, %s2280_s1 }
0x1e44   :  { %v2161_v1 = vpop.eup %2160 }
0x1e45   :  { %v1449_v3 = vadd.f32 1.0, %v2161_v1 }
0x1e47   :  { %2162 = vrcp.f32 %v1449_v3  ;;  %v1461_v13 = vand.u32 2147483648, %v1449_v3  ;;  %vm1455_vm13 = vweird.f32 %v1449_v3  ;;  %v1459_v14 = vand.u32 2147483647, %v1449_v3 }
0x1e48   :  { %2164 = vtanh.f32 %v635_v21 }
0x1e49   :  { %v1462_v19 = vor.u32 1.1754944e-38, %v1461_v13  ;;  %vm1460_vm2 = vcmp.eq.f32.partialorder %v1459_v14, 8.507059e+37 }
0x1e4d   :  { %v2163_v6 = vpop.eup %2162 }
0x1e4e   :  { %v1451_v8 = vmul.f32 %v2163_v6, %v1449_v3  ;;  %vm1456_vm12 = vweird.f32 %v2163_v6  ;;  %v2165_v17 = vpop.eup %2164 }
0x1e4f   :  { %vm1457_vm14 = vmor %vm1455_vm13, %vm1456_vm12 }
0x1e50   :  { %v1452_v9 = vsub.f32 1.0, %v1451_v8 }
0x1e52   :  { %v1453_v10 = vmul.f32 %v2163_v6, %v1452_v9 }
0x1e54   :  { %v1454_v11 = vadd.f32 %v2163_v6, %v1453_v10 }
0x1e56   :  { %v1458_v18 = vsel %vm1457_vm14, %v2163_v6, %v1454_v11 }
0x1e57   :  { %v1463_v24 = vsel %vm1460_vm2, %v1462_v19, %v1458_v18 }
0x1e58   :  { %v1469_v31 = vmul.f32 %v1467_v16, %v1463_v24 }
0x1eb5   :  { %v1472_v32 = vpop.permute.xlu0 %1471 }
0x1eb6   :  { %v1474_v26 = vmul.f32 %v1472_v32, %v1463_v24 }
0x1eb8   :  { %1476 = vrot.lane.b32.xlu1 %v1474_v26, %s2281_s4 }
0x1ec0   :  { %661 = vrot.lane.b32.xlu1 %v2165_v17, %s2280_s1 }
0x1f2a   :  { %v1477_v20 = vpop.permute.xlu1 %1476 }
0x1f2b   :  { %v2760_v39 = vadd.f32 %v1477_v20, %v1469_v31 }
0x1f2d   :  { %2166 = vtanh.f32 %v2760_v39  ;;  %v1537_v18 = vrot.slane %v2760_v39, 6 }
0x1f2e   :  { %2168 = vpow2.f32 %v1974_v37 }
0x1f32   :  { %v662_v47 = vpop.permute.xlu1 %661 }
0x1f33   :  { %v2167_v40 = vpop.eup %2166 }
0x1f34   :  { %1482 = vrot.lane.b32.xlu2 %v2167_v40, %s2280_s1  ;;  %v2169_v25 = vpop.eup %2168 }
0x1f35   :  { %v639_v27 = vadd.f32 1.0, %v2169_v25 }
0x1f37   :  { %2170 = vrcp.f32 %v639_v27  ;;  %v651_v45 = vand.u32 2147483648, %v639_v27  ;;  %vm645_vm4 = vweird.f32 %v639_v27  ;;  %v649_v4 = vand.u32 2147483647, %v639_v27 }
0x1f39   :  { %v652_v46 = vor.u32 1.1754944e-38, %v651_v45  ;;  %vm650_vm7 = vcmp.eq.f32.partialorder %v649_v4, 8.507059e+37 }
0x1f3d   :  { %v2171_v41 = vpop.eup %2170 }
0x1f3e   :  { %v641_v42 = vmul.f32 %v2171_v41, %v639_v27  ;;  %vm646_vm3 = vweird.f32 %v2171_v41 }
0x1f3f   :  { %vm647_vm5 = vmor %vm645_vm4, %vm646_vm3 }
0x1f40   :  { %v642_v43 = vsub.f32 1.0, %v641_v42 }
0x1f42   :  { %v643_v44 = vmul.f32 %v2171_v41, %v642_v43 }
0x1f44   :  { %v644_v29 = vadd.f32 %v2171_v41, %v643_v44 }
0x1f46   :  { %v648_v5 = vsel %vm647_vm5, %v2171_v41, %v644_v29 }
0x1f47   :  { %v653_v48 = vsel %vm650_vm7, %v652_v46, %v648_v5 }
0x1f48   :  { %v664_v49 = vmul.f32 %v662_v47, %v653_v48  ;;  %v659_v55 = vmul.f32 %v657_v53, %v653_v48 }
0x1f8e   :  { %v1483_v2 = vpop.permute.xlu2 %1482 }
0x1f8f   :  { %v1485_v28 = vmul.f32 %v1483_v2, %v1463_v24 }
0x1f91   :  { %v1487_v30 = vrot.slane %v1485_v28, 4 }
0x1f93   :  { %1488 = vrot.lane.b32.xlu0 %v1487_v30, %s2281_s4 }
0x1f9b   :  { %666 = vrot.lane.b32.xlu0 %v664_v49, %s2281_s4 }
0x2005   :  { %v1489_v50 = vpop.permute.xlu0 %1488 }
0x2006   :  { %1999 = vmatmul.msk.f32.vlgmr.msrb.gmra.mxu0 %vm193_vm6, %v1489_v50 }
0x200d   :  { %v667_v54 = vpop.permute.xlu0 %666 }
0x200e   :  { %v669_v56 = vadd.f32 %v667_v54, %v659_v55 }
0x2083   :  { %v1509_v51 = vpop.f32.mrf.mxu0 }
0x2084   :  { %v1513_v38 = vrot.slane %v1509_v51, 2 }
0x2086   :  { %v1515_v52 = vadd.f32 %v1513_v38, %v2687_v58  ;;  %v1212_v58 = vsel %vm98_vm0, %v1211_v60, %v2568_v15 }
0x2087   :  { %v1213_v12 = vsel %vm1203_vm10, %v1212_v58, %v2493_v23 }
0x2088   :  { %2172 = vtanh.f32 %v1515_v52  ;;  %v2000_v61 = vmul.f32 -1.442695, %v1515_v52 }
0x2089   :  { %2174 = vtanh.f32 %v669_v56 }
0x208a   :  { %2176 = vpow2.f32 %v2000_v61 }
0x208e   :  { %v2173_v59 = vpop.eup %2172 }
0x208f   :  { %1541 = vrot.lane.b32.xlu2 %v2173_v59, %s2280_s1  ;;  %v2175_v7 = vpop.eup %2174 }
0x2090   :  { %v2177_v62 = vpop.eup %2176 }
0x2091   :  { %v1519_v63 = vadd.f32 1.0, %v2177_v62 }
0x2093   :  { %2178 = vrcp.f32 %v1519_v63  ;;  %v1531_v22 = vand.u32 2147483648, %v1519_v63  ;;  %vm1525_vm15 = vweird.f32 %v1519_v63  ;;  %v1529_v35 = vand.u32 2147483647, %v1519_v63 }
0x2095   :  { %v1532_v9 = vor.u32 1.1754944e-38, %v1531_v22  ;;  %vm1530_vm9 = vcmp.eq.f32.partialorder %v1529_v35, 8.507059e+37 }
0x2097   :  { %672 = vrot.lane.b32.xlu2 %v2175_v7, %s2280_s1 }
0x2099   :  { %v2179_v0 = vpop.eup %2178 }
0x209a   :  { %v1521_v1 = vmul.f32 %v2179_v0, %v1519_v63  ;;  %vm1526_vm8 = vweird.f32 %v2179_v0 }
0x209b   :  { %vm1527_vm0 = vmor %vm1525_vm15, %vm1526_vm8 }
0x209c   :  { %v1522_v3 = vsub.f32 1.0, %v1521_v1 }
0x209e   :  { %v1523_v6 = vmul.f32 %v2179_v0, %v1522_v3 }
0x209f   :  { %1226 = vrot.lane.b32.xlu2 %v1213_v12, %s2280_s1 }
0x20a0   :  { %v1524_v8 = vadd.f32 %v2179_v0, %v1523_v6 }
0x20a2   :  { %v1528_v15 = vsel %vm1527_vm0, %v2179_v0, %v1524_v8 }
0x20a3   :  { %v1533_v10 = vsel %vm1530_vm9, %v1532_v9, %v1528_v15 }
0x20a4   :  { %v1539_v19 = vmul.f32 %v1537_v18, %v1533_v10 }
0x20e9   :  { %v1542_v23 = vpop.permute.xlu2 %1541 }
0x20ea   :  { %v1544_v11 = vmul.f32 %v1542_v23, %v1533_v10 }
0x20ec   :  { %1546 = vrot.lane.b32.xlu1 %v1544_v11, %s2281_s4 }
0x20f1   :  { %v673_v13 = vpop.permute.xlu2 %672 }
0x20f2   :  { %v675_v14 = vmul.f32 %v673_v13, %v653_v48 }
0x20f4   :  { %v1207_v36 = vsel %vm1203_vm10, %v2625_v34, %v675_v14 }
0x20f5   :  { %1218 = vrot.lane.b32.xlu1 %v1207_v36, %s2281_s4 }
0x20f9   :  { %v1227_v26 = vpop.permute.xlu2 %1226 }
0x215e   :  { %v1547_v21 = vpop.permute.xlu1 %1546 }
0x215f   :  { %v1549_v32 = vadd.f32 %v1547_v21, %v1539_v19 }
0x2161   :  { %2180 = vtanh.f32 %v1549_v32  ;;  %v1604_v50 = vrot.slane %v1549_v32, 6 }
0x2167   :  { %v2181_v24 = vpop.eup %2180  ;;  %v1219_v17 = vpop.permute.xlu1 %1218 }
0x2168   :  { %1552 = vrot.lane.b32.xlu0 %v2181_v24, %s2280_s1  ;;  %v1231_v16 = vsel %vm193_vm6, %v1219_v17, %v1227_v26 }
0x2169   :  { %1991 = vmatmul.msk.f32.gmra.mxu2 %vm1254_vm1, %v1231_v16  ;;  %1993 = vmatmul.msk.f32.gmra.mxu3 %vm1254_vm1, %v1231_v16 }
0x21da   :  { %v1553_v34 = vpop.permute.xlu0 %1552 }
0x21db   :  { %v1555_v31 = vmul.f32 %v1553_v34, %v1533_v10 }
0x21dd   :  { %v1557_v20 = vrot.slane %v1555_v31, 6 }
0x21df   :  { %1558 = vrot.lane.b32.xlu0 %v1557_v20, %s2281_s4 }
0x21ec   :  { %v1281_v40 = vpop.f32.mrf.mxu2 }
0x21ed   :  { %v2792_v37 = vadd.f32 %v1281_v40, %v1250_v57 }
0x2251   :  { %v1559_v39 = vpop.permute.xlu0 %1558 }
0x2252   :  { %2001 = vmatmul.msk.f32.vlgmr.msrb.gmra.mxu1 %vm193_vm6, %v1559_v39 }
0x22cf   :  { %v1579_v25 = vpop.f32.mrf.mxu1 }
0x22d0   :  { %v1582_v27 = vadd.f32 %v1579_v25, %v2792_v37 }
0x22d2   :  { %2182 = vtanh.f32 %v1582_v27  ;;  %v2002_v42 = vmul.f32 -1.442695, %v1582_v27 }
0x22d4   :  { %2184 = vpow2.f32 %v2002_v42 }
0x22d8   :  { %v2183_v41 = vpop.eup %2182 }
0x22d9   :  { %1608 = vrot.lane.b32.xlu1 %v2183_v41, %s2280_s1 }
0x22da   :  { %v2185_v43 = vpop.eup %2184 }
0x22db   :  { %v1586_v44 = vadd.f32 1.0, %v2185_v43 }
0x22dd   :  { %2186 = vrcp.f32 %v1586_v44  ;;  %v1598_v57 = vand.u32 2147483648, %v1586_v44  ;;  %vm1592_vm11 = vweird.f32 %v1586_v44  ;;  %v1596_v4 = vand.u32 2147483647, %v1586_v44 }
0x22df   :  { %v1599_v46 = vor.u32 1.1754944e-38, %v1598_v57  ;;  %vm1597_vm13 = vcmp.eq.f32.partialorder %v1596_v4, 8.507059e+37 }
0x22e3   :  { %v2187_v2 = vpop.eup %2186 }
0x22e4   :  { %v1588_v28 = vmul.f32 %v2187_v2, %v1586_v44  ;;  %vm1593_vm10 = vweird.f32 %v2187_v2 }
0x22e5   :  { %vm1594_vm12 = vmor %vm1592_vm11, %vm1593_vm10 }
0x22e6   :  { %v1589_v29 = vsub.f32 1.0, %v1588_v28 }
0x22e8   :  { %v1590_v30 = vmul.f32 %v2187_v2, %v1589_v29 }
0x22ea   :  { %v1591_v45 = vadd.f32 %v2187_v2, %v1590_v30 }
0x22ec   :  { %v1595_v5 = vsel %vm1594_vm12, %v2187_v2, %v1591_v45 }
0x22ed   :  { %v1600_v48 = vsel %vm1597_vm13, %v1599_v46, %v1595_v5 }
0x22ee   :  { %v1606_v51 = vmul.f32 %v1604_v50, %v1600_v48 }
0x234b   :  { %v1609_v47 = vpop.permute.xlu1 %1608 }
0x234c   :  { %v1611_v49 = vmul.f32 %v1609_v47, %v1600_v48  ;;  %v1251_v47 = vperm.slane %v2682_v33, 1 }
0x234e   :  { %1613 = vrot.lane.b32.xlu2 %v1611_v49, %s2281_s4 }
0x23a8   :  { %v1614_v38 = vpop.permute.xlu2 %1613 }
0x23a9   :  { %v1616_v52 = vadd.f32 %v1614_v38, %v1606_v51 }
0x23ab   :  { %2188 = vtanh.f32 %v1616_v52  ;;  %v1673_v11 = vrot.slane %v1616_v52, 6 }
0x23b1   :  { %v2189_v53 = vpop.eup %2188 }
0x23b2   :  { %1619 = vrot.lane.b32.xlu0 %v2189_v53, %s2280_s1 }
0x2424   :  { %v1620_v54 = vpop.permute.xlu0 %1619 }
0x2425   :  { %v1622_v55 = vmul.f32 %v1620_v54, %v1600_v48  ;;  %v1303_v48 = vpop.f32.mrf.mxu3 }
0x2426   :  { %v1304_v49 = vadd.f32 %v1303_v48, %v1251_v47  ;;  %v1918_v47 = vld [vmem:[%s2882_s11 + $0x18] sm:$0xff]  ;;  %v1917_v48 = vld [vmem:[%s2882_s11 + $0x10] sm:$0xff] }
0x2427   :  { %1624 = vrot.lane.b32.xlu1 %v1622_v55, %s2281_s4  ;;  %1938 = vmatpush.msrb.mxu0 %v1918_v47 }
0x2428   :  { %v2009_v33 = vmul.f32 -1.442695, %v1304_v49 }
0x2429   :  { %1939 = vmatpush.msrb.mxu0 %v1917_v48 }
0x2499   :  { %v1625_v56 = vpop.permute.xlu1 %1624 }
0x249a   :  { %2003 = vmatmul.msk.f32.vlgmr.msra.gmra.mxu0 %vm193_vm6, %v1625_v56 }
0x2517   :  { %v1645_v59 = vpop.f32.mrf.mxu0 }
0x2518   :  { %v1649_v7 = vrot.slane %v1645_v59, 6 }
0x251a   :  { %v1651_v60 = vadd.f32 %v1649_v7, %v2792_v37 }
0x251c   :  { %2190 = vtanh.f32 %v1651_v60  ;;  %v2004_v12 = vmul.f32 -1.442695, %v1651_v60 }
0x251e   :  { %2192 = vpow2.f32 %v2004_v12 }
0x2522   :  { %v2191_v58 = vpop.eup %2190 }
0x2523   :  { %1677 = vrot.lane.b32.xlu2 %v2191_v58, %s2280_s1 }
0x2524   :  { %v2193_v61 = vpop.eup %2192 }
0x2525   :  { %v1655_v62 = vadd.f32 1.0, %v2193_v61 }
0x2527   :  { %2194 = vrcp.f32 %v1655_v62  ;;  %v1667_v8 = vand.u32 2147483648, %v1655_v62  ;;  %vm1661_vm2 = vweird.f32 %v1655_v62  ;;  %v1665_v22 = vand.u32 2147483647, %v1655_v62 }
0x2529   :  { %v1668_v15 = vor.u32 1.1754944e-38, %v1667_v8  ;;  %vm1666_vm4 = vcmp.eq.f32.partialorder %v1665_v22, 8.507059e+37 }
0x252d   :  { %v2195_v63 = vpop.eup %2194 }
0x252e   :  { %v1657_v0 = vmul.f32 %v2195_v63, %v1655_v62  ;;  %vm1662_vm14 = vweird.f32 %v2195_v63 }
0x252f   :  { %vm1663_vm3 = vmor %vm1661_vm2, %vm1662_vm14 }
0x2530   :  { %v1658_v1 = vsub.f32 1.0, %v1657_v0 }
0x2532   :  { %v1659_v3 = vmul.f32 %v2195_v63, %v1658_v1 }
0x2534   :  { %v1660_v6 = vadd.f32 %v2195_v63, %v1659_v3 }
0x2536   :  { %v1664_v35 = vsel %vm1663_vm3, %v2195_v63, %v1660_v6 }
0x2537   :  { %v1669_v23 = vsel %vm1666_vm4, %v1668_v15, %v1664_v35 }
0x2538   :  { %v1675_v13 = vmul.f32 %v1673_v11, %v1669_v23 }
0x257d   :  { %v1678_v9 = vpop.permute.xlu2 %1677 }
0x257e   :  { %v1680_v10 = vmul.f32 %v1678_v9, %v1669_v23 }
0x2580   :  { %1682 = vrot.lane.b32.xlu0 %v1680_v10, %s2281_s4 }
0x25f2   :  { %v1683_v14 = vpop.permute.xlu0 %1682 }
0x25f3   :  { %v1685_v36 = vadd.f32 %v1683_v14, %v1675_v13 }
0x25f5   :  { %2196 = vtanh.f32 %v1685_v36  ;;  %v1743_v57 = vrot.slane %v1685_v36, 6 }
0x25fb   :  { %v2197_v18 = vpop.eup %2196 }
0x25fc   :  { %1688 = vrot.lane.b32.xlu1 %v2197_v18, %s2280_s1 }
0x266e   :  { %v1689_v19 = vpop.permute.xlu1 %1688 }
0x266f   :  { %v1691_v21 = vmul.f32 %v1689_v19, %v1669_v23 }
0x2671   :  { %v1693_v32 = vrot.slane %v1691_v21, 2 }
0x2673   :  { %1694 = vrot.lane.b32.xlu2 %v1693_v32, %s2281_s4 }
0x26cd   :  { %v1695_v24 = vpop.permute.xlu2 %1694 }
0x26ce   :  { %2005 = vmatmul.msk.f32.vlgmr.msra.gmra.mxu1 %vm193_vm6, %v1695_v24 }
0x274b   :  { %v1715_v26 = vpop.f32.mrf.mxu1 }
0x274c   :  { %v1719_v17 = vrot.slane %v1715_v26, 4 }
0x274e   :  { %v1721_v16 = vadd.f32 %v1719_v17, %v2792_v37 }
0x2750   :  { %2198 = vtanh.f32 %v1721_v16  ;;  %v2006_v31 = vmul.f32 -1.442695, %v1721_v16 }
0x2752   :  { %2200 = vpow2.f32 %v2006_v31 }
0x2756   :  { %v2199_v34 = vpop.eup %2198 }
0x2757   :  { %1747 = vrot.lane.b32.xlu0 %v2199_v34, %s2280_s1 }
0x2758   :  { %v2201_v20 = vpop.eup %2200 }
0x2759   :  { %v1725_v39 = vadd.f32 1.0, %v2201_v20 }
0x275b   :  { %2202 = vrcp.f32 %v1725_v39  ;;  %v1737_v43 = vand.u32 2147483648, %v1725_v39  ;;  %vm1731_vm7 = vweird.f32 %v1725_v39  ;;  %v1735_v44 = vand.u32 2147483647, %v1725_v39 }
0x275d   :  { %v1738_v28 = vor.u32 1.1754944e-38, %v1737_v43  ;;  %vm1736_vm15 = vcmp.eq.f32.partialorder %v1735_v44, 8.507059e+37  ;;  %v1885_v44 = vld [vmem:[%s2880_s9 + $0x38] sm:$0xff] }
0x275e   :  { %1902 = vmatpush.msrb.mxu3 %v1885_v44 }
0x2761   :  { %v2203_v40 = vpop.eup %2202 }
0x2762   :  { %v1727_v25 = vmul.f32 %v2203_v40, %v1725_v39  ;;  %vm1732_vm5 = vweird.f32 %v2203_v40 }
0x2763   :  { %vm1733_vm8 = vmor %vm1731_vm7, %vm1732_vm5 }
0x2764   :  { %v1728_v27 = vsub.f32 1.0, %v1727_v25 }
0x2766   :  { %v1729_v41 = vmul.f32 %v2203_v40, %v1728_v27 }
0x2768   :  { %v1730_v42 = vadd.f32 %v2203_v40, %v1729_v41 }
0x276a   :  { %v1734_v2 = vsel %vm1733_vm8, %v2203_v40, %v1730_v42 }
0x276b   :  { %v1739_v30 = vsel %vm1736_vm15, %v1738_v28, %v1734_v2  ;;  %v1884_v2 = vld [vmem:[%s2880_s9 + $0x30] sm:$0xff]  ;;  %v1883_v28 = vld [vmem:[%s2880_s9 + $0x28] sm:$0xff] }
0x276c   :  { %v1745_v4 = vmul.f32 %v1743_v57, %v1739_v30  ;;  %1903 = vmatpush.msrb.mxu3 %v1884_v2  ;;  %v1879_v57 = vld [vmem:[%s2880_s9 + $0x8] sm:$0xff] }
0x276e   :  { %1904 = vmatpush.msrb.mxu3 %v1883_v28 }
0x27c9   :  { %v1748_v29 = vpop.permute.xlu0 %1747 }
0x27ca   :  { %v1750_v45 = vmul.f32 %v1748_v29, %v1739_v30  ;;  %v1882_v29 = vld [vmem:[%s2880_s9 + $0x20] sm:$0xff] }
0x27cb   :  { %1905 = vmatpush.msrb.mxu3 %v1882_v29 }
0x27cc   :  { %1752 = vrot.lane.b32.xlu1 %v1750_v45, %s2281_s4  ;;  %v1880_v45 = vld [vmem:[%s2880_s9 + $0x10] sm:$0xff] }
0x283e   :  { %v1753_v5 = vpop.permute.xlu1 %1752 }
0x283f   :  { %v2809_v46 = vadd.f32 %v1753_v5, %v1745_v4 }
0x2841   :  { %2204 = vtanh.f32 %v2809_v46  ;;  %v1813_v39 = vrot.slane %v2809_v46, 6  ;;  %v1878_v46 = vld [vmem:[%s2880_s9] sm:$0xff] }
0x2842   :  { %2206 = vtanh.f32 %v1304_v49 }
0x2843   :  { %2208 = vpow2.f32 %v2009_v33 }
0x2847   :  { %v2205_v50 = vpop.eup %2204 }
0x2848   :  { %1758 = vrot.lane.b32.xlu2 %v2205_v50, %s2280_s1  ;;  %v2207_v51 = vpop.eup %2206 }
0x2849   :  { %v2209_v55 = vpop.eup %2208 }
0x284a   :  { %v1835_v56 = vadd.f32 1.0, %v2209_v55 }
0x284c   :  { %2210 = vrcp.f32 %v1835_v56  ;;  %v1847_v1 = vand.u32 2147483648, %v1835_v56  ;;  %vm1841_vm9 = vweird.f32 %v1835_v56  ;;  %v1845_v3 = vand.u32 2147483647, %v1835_v56 }
0x284e   :  { %v1848_v8 = vor.u32 1.1754944e-38, %v1847_v1  ;;  %vm1846_vm11 = vcmp.eq.f32.partialorder %v1845_v3, 8.507059e+37 }
0x2850   :  { %1854 = vrot.lane.b32.xlu2 %v2207_v51, %s2280_s1 }
0x2852   :  { %v2211_v59 = vpop.eup %2210 }
0x2853   :  { %v1837_v7 = vmul.f32 %v2211_v59, %v1835_v56  ;;  %vm1842_vm0 = vweird.f32 %v2211_v59 }
0x2854   :  { %vm1843_vm10 = vmor %vm1841_vm9, %vm1842_vm0 }
0x2855   :  { %v1838_v12 = vsub.f32 1.0, %v1837_v7 }
0x2857   :  { %v1839_v62 = vmul.f32 %v2211_v59, %v1838_v12 }
0x2859   :  { %v1840_v63 = vadd.f32 %v2211_v59, %v1839_v62 }
0x285b   :  { %v1844_v6 = vsel %vm1843_vm10, %v2211_v59, %v1840_v63  ;;  %v2021_v59 = vld [vmem:[#allocation2] ss:$0 sm:$0xff] }
0x285c   :  { %v1849_v35 = vsel %vm1846_vm11, %v1848_v8, %v1844_v6 }
0x285d   :  { %v1852_v16 = vmul.f32 0.0, %v1849_v35 }
0x28a2   :  { %v1759_v38 = vpop.permute.xlu2 %1758 }
0x28a3   :  { %v1761_v52 = vmul.f32 %v1759_v38, %v1739_v30  ;;  %v1881_v30 = vld [vmem:[%s2880_s9 + $0x18] sm:$0xff] }
0x28a4   :  { %1906 = vmatpush.msrb.mxu3 %v1881_v30 }
0x28a5   :  { %v1763_v53 = vrot.slane %v1761_v52, 4  ;;  %v1916_v52 = vld [vmem:[%s2882_s11 + $0x8] sm:$0xff] }
0x28a6   :  { %1907 = vmatpush.msrb.mxu3 %v1880_v45  ;;  %1940 = vmatpush.msrb.mxu0 %v1916_v52 }
0x28a7   :  { %1764 = vrot.lane.b32.xlu0 %v1763_v53, %s2281_s4  ;;  %v1915_v53 = vld [vmem:[%s2882_s11] sm:$0xff] }
0x28a8   :  { %1908 = vmatpush.msrb.mxu3 %v1879_v57  ;;  %1941 = vmatpush.msrb.mxu0 %v1915_v53 }
0x28aa   :  { %v1855_v22 = vpop.permute.xlu2 %1854  ;;  %1909 = vmatpush.msrb.mxu3 %v1878_v46 }
0x28ab   :  { %v1857_v15 = vmul.f32 %v1855_v22, %v1849_v35 }
0x2919   :  { %v1765_v54 = vpop.permute.xlu0 %1764 }
0x291a   :  { %2007 = vmatmul.msk.f32.vlgmr.msrb.gmra.mxu2 %vm193_vm6, %v1765_v54  ;;  %v2020_v54 = vld [vmem:[%s2881_s10] ss:$0 sm:$0xff] }
0x299d   :  { %v1785_v60 = vpop.f32.mrf.mxu2 }
0x299e   :  { %v1789_v58 = vrot.slane %v1785_v60, 2 }
0x29a0   :  { %v1791_v61 = vadd.f32 %v1789_v58, %v2792_v37 }
0x29a2   :  { %2212 = vtanh.f32 %v1791_v61  ;;  %v2008_v37 = vmul.f32 -1.442695, %v1791_v61 }
0x29a4   :  { %2214 = vpow2.f32 %v2008_v37 }
0x29a8   :  { %v2213_v0 = vpop.eup %2212 }
0x29a9   :  { %1817 = vrot.lane.b32.xlu1 %v2213_v0, %s2280_s1 }
0x29aa   :  { %v2215_v9 = vpop.eup %2214 }
0x29ab   :  { %v1795_v23 = vadd.f32 1.0, %v2215_v9 }
0x29ad   :  { %2216 = vrcp.f32 %v1795_v23  ;;  %v1807_v18 = vand.u32 2147483648, %v1795_v23  ;;  %vm1801_vm13 = vweird.f32 %v1795_v23  ;;  %v1805_v19 = vand.u32 2147483647, %v1795_v23 }
0x29af   :  { %v1808_v32 = vor.u32 1.1754944e-38, %v1807_v18  ;;  %vm1806_vm2 = vcmp.eq.f32.partialorder %v1805_v19, 8.507059e+37 }
0x29b1   :  { %1859 = vrot.lane.b32.xlu1 %v1857_v15, %s2281_s4 }
0x29b3   :  { %v2217_v10 = vpop.eup %2216 }
0x29b4   :  { %v1797_v11 = vmul.f32 %v2217_v10, %v1795_v23  ;;  %vm1802_vm12 = vweird.f32 %v2217_v10 }
0x29b5   :  { %vm1803_vm14 = vmor %vm1801_vm13, %vm1802_vm12 }
0x29b6   :  { %v1798_v13 = vsub.f32 1.0, %v1797_v11 }
0x29b8   :  { %v1799_v14 = vmul.f32 %v2217_v10, %v1798_v13 }
0x29ba   :  { %v1800_v36 = vadd.f32 %v2217_v10, %v1799_v14 }
0x29bc   :  { %v1804_v21 = vsel %vm1803_vm14, %v2217_v10, %v1800_v36 }
0x29bd   :  { %v1809_v26 = vsel %vm1806_vm2, %v1808_v32, %v1804_v21 }
0x29be   :  { %v1815_v40 = vmul.f32 %v1813_v39, %v1809_v26 }
0x2a1b   :  { %v1818_v24 = vpop.permute.xlu1 %1817 }
0x2a1c   :  { %v1820_v17 = vmul.f32 %v1818_v24, %v1809_v26 }
0x2a1e   :  { %1822 = vrot.lane.b32.xlu0 %v1820_v17, %s2281_s4 }
0x2a23   :  { %v1860_v34 = vpop.permute.xlu1 %1859 }
0x2a24   :  { %v1862_v31 = vadd.f32 %v1860_v34, %v1852_v16 }
0x2a26   :  { %2218 = vtanh.f32 %v1862_v31 }
0x2a2c   :  { %v2219_v20 = vpop.eup %2218 }
0x2a2d   :  { %1865 = vrot.lane.b32.xlu0 %v2219_v20, %s2280_s1 }
0x2a90   :  { %v1823_v25 = vpop.permute.xlu0 %1822 }
0x2a91   :  { %v1825_v27 = vadd.f32 %v1823_v25, %v1815_v40 }
0x2a93   :  { %2220 = vtanh.f32 %v1825_v27 }
0x2a99   :  { %v2221_v41 = vpop.eup %2220 }
0x2a9a   :  { %1828 = vrot.lane.b32.xlu2 %v2221_v41, %s2280_s1 }
0x2a9f   :  { %v1866_v42 = vpop.permute.xlu0 %1865 }
0x2aa0   :  { %v1868_v43 = vmul.f32 %v1866_v42, %v1849_v35 }
0x2aa2   :  { %1874 = vrot.lane.b32.xlu2 %v1868_v43, %s2280_s1 }
0x2af4   :  { %v1829_v4 = vpop.permute.xlu2 %1828 }
0x2af5   :  { %v1831_v5 = vmul.f32 %v1829_v4, %v1809_v26 }
0x2af7   :  { %1870 = vrot.lane.b32.xlu1 %v1831_v5, %s2281_s4 }
0x2afc   :  { %v1875_v49 = vpop.permute.xlu2 %1874 }
0x2b69   :  { %v1871_v50 = vpop.permute.xlu1 %1870 }
0x2b6a   :  { %v1877_v51 = vsel %vm193_vm6, %v1871_v50, %v1875_v49 }
0x2b6b   :  { %v1891_v38 = vrot.slane %v1877_v51, 6 }
0x2b6d   :  { %2010 = vmatmul.msk.f32.vlgmr.msrb.gmra.mxu3 %vm1254_vm1, %v1891_v38  ;;  %vm1946_vm1 = vcmask 1024  }
0x2bf0   :  { %v1911_v33 = vpop.f32.mrf.mxu3 }
0x2bf1   :  { %v1912_v55 = vadd.f32 %v2020_v54, %v1911_v33 }
0x2bf3   :  { %v1914_v56 = vmax.f32 %v1912_v55, 0.0 }
0x2bf5   :  { %2011 = vmatmul.msk.f32.vlgmr.msrb.gmra.mxu0 %vm193_vm6, %v1914_v56 }
0x2c72   :  { %v1943_v7 = vpop.f32.mrf.mxu0 }
0x2c73   :  { %v1944_v60 = vadd.f32 %v2021_v59, %v1943_v7 }
0x2c75   :  { %1947 = vst.msk [vmem:[%s2884_s13] sm:$0x3] %vm1946_vm1, %v1944_v60 }
0x2c76   :  { %1952 = vsyncpa [#allocation4], 1 }
0x2c77   :  { %1953 = vsyncpa [#allocation6], 1 }

</bundles_post_ra>
